<compile_context>
chip_gen: v7x
topology: tpu7x:2x2x1
jax: 0.10.0
libtpu: 0.0.40
codegen_flags: <defaults>
</compile_context>

<pallas_src>
from functools import partial

import jax
import jax.numpy as jnp
from jax import lax
from jax.experimental import pallas as pl
from jax.experimental.pallas import tpu as pltpu

NEG_SLOPE = 0.01   # LeakyReLU negative_slope (module default)
EPS = 1e-5         # BatchNorm eps (module default)


# ----------------------------- Pallas kernel --------------------------------

def _fused_initial_conv_kernel(width, guard, neg_slope,
                               x_ref, ml_ref, mr_ref,
                               w0_ref, b0_ref, w1_ref, b1_ref, w2_ref, b2_ref,
                               o_ref, buf_ref):
    """One batch image per grid step; all three conv layers fused in VMEM.

    Layout: activations are (channels, flat_pixel) with raster-order pixels on
    the lane axis and `guard` zero lane-columns left/right of the image
    (vertical halo).  A 3x3 tap (ky, kx) is a lane window shifted by
    (ky-1)*width + (kx-1); horizontal zero-padding is emulated by masking the
    kx==0 / kx==2 tap *groups* once at the left / right image columns.
    """
    cout, ptot = buf_ref.shape
    num_pix = o_ref.shape[2]                       # P = H * W

    # Re-zero the inter-layer buffer's guard columns (cheap: 2 small stores).
    # Not gated on pl.program_id(0)==0 -- with "parallel" megacore sharding a
    # second TensorCore never executes step 0, so its private scratch guards
    # would stay uninitialised.
    buf_ref[:, 0:guard] = jnp.zeros((cout, guard), buf_ref.dtype)
    buf_ref[:, guard + num_pix:ptot] = jnp.zeros(
        (cout, ptot - guard - num_pix), buf_ref.dtype)

    not_left = ml_ref[...]    # (1, P) f32: 0.0 where col == 0       (kx == 0 taps)
    not_right = mr_ref[...]   # (1, P) f32: 0.0 where col == W - 1   (kx == 2 taps)

    def leaky(v):
        return jnp.where(v >= 0, v, neg_slope * v)

    def conv3x3(tap, w_ref, b_ref):
        """3x3 / stride 1 / pad 1 conv as 9 (Cout, C) @ (C, P) MXU matmuls.

        `tap(ky, kx)` yields the bf16 (C, P) window shifted by (ky-1, kx-1).
        Accumulation is in registers (f32); horizontal-pad masks are applied
        once per column group (2 masked multiplies per layer).
        """
        def mm(t, ky, kx):
            return jnp.dot(w_ref[t], tap(ky, kx),
                           preferred_element_type=jnp.float32)

        # centre column (kx == 1): horizontally interior, no mask.
        acc = mm(1, 0, 1)
        acc += mm(4, 1, 1)
        acc += mm(7, 2, 1)
        # left-neighbour taps (kx == 0): masked once where output col == 0.
        acc_l = mm(0, 0, 0)
        acc_l += mm(3, 1, 0)
        acc_l += mm(6, 2, 0)
        # right-neighbour taps (kx == 2): masked once where output col == W-1.
        acc_r = mm(2, 0, 2)
        acc_r += mm(5, 1, 2)
        acc_r += mm(8, 2, 2)
        return acc + acc_l * not_left + acc_r * not_right + b_ref[...]

    def x_tap(ky, kx):
        start = guard + (ky - 1) * width + (kx - 1)          # static offset
        return x_ref[0, :, start:start + num_pix]            # (Cin, P) bf16

    def buf_tap(ky, kx):
        start = guard + (ky - 1) * width + (kx - 1)          # static offset
        return buf_ref[:, start:start + num_pix]             # (Cout, P) bf16

    # conv0 -> BatchNorm(in_0) [folded into w0/b0] -> LeakyReLU
    buf_ref[:, guard:guard + num_pix] = leaky(
        conv3x3(x_tap, w0_ref, b0_ref)).astype(buf_ref.dtype)
    # conv1 -> Dropout2d (identity in eval) -> BatchNorm(in_1) [folded] -> LeakyReLU
    # TODO(synk): training-mode Dropout2d (random whole-channel zeroing) not implemented.
    buf_ref[:, guard:guard + num_pix] = leaky(
        conv3x3(buf_tap, w1_ref, b1_ref)).astype(buf_ref.dtype)
    # conv2 (bias only; no norm / activation)
    # TODO(synk): residual path (network_kwargs['res']=True) not wired; default is False.
    o_ref[0] = conv3x3(buf_tap, w2_ref, b2_ref).astype(o_ref.dtype)


# ------------------------------ JAX wrapper ----------------------------------

def _taps(w_oihw, scale=None):
    """PyTorch (Cout,Cin,3,3) -> (9, Cout, Cin) bf16, tap index t = ky*3 + kx.

    Optional per-output-channel `scale` folds the inference BatchNorm into the
    weights (in f32, before the bf16 round)."""
    co, ci = w_oihw.shape[0], w_oihw.shape[1]
    w = jnp.transpose(w_oihw, (2, 3, 0, 1)).reshape(9, co, ci)
    if scale is not None:
        w = w * scale.reshape(1, co, 1)
    return w.astype(jnp.bfloat16)


def _fold_bn(gamma, beta, mean, var):
    """Inference BatchNorm as y = x*s + t (running stats)."""
    s = gamma / jnp.sqrt(var + EPS)
    t = beta - mean * s
    return s, t


def _pad_bytes(shape, dtype):
    """Bytes of `shape` after padding minor dims to TPU (sublane, 128-lane) tiles."""
    item = jnp.dtype(dtype).itemsize
    sub = 32 // item                       # 8 sublanes for f32, 16 for bf16
    dims = list(shape)
    dims[-1] = -(-dims[-1] // 128) * 128
    if len(dims) >= 2:
        dims[-2] = -(-dims[-2] // sub) * sub
    n = 1
    for d in dims:
        n *= d
    return n * item


def initial_conv_forward(x_nchw, params):
    """Forward pass of InitialConv (inference mode)."""
    N, cin, H, W = x_nchw.shape
    cout = params["w0"].shape[0]
    P = H * W
    guard = ((W + 1 + 127) // 128) * 128       # zero guard lanes (>= W+1), 128-aligned
    ptot = P + 2 * guard

    # NCHW -> (N, C, P) is a pure reshape (channels stay on sublanes, flat
    # pixels on lanes).  bf16 halves the only sizeable HBM input stream; all
    # matmul accumulation in-kernel is f32.  Guard zero lanes give the vertical
    # halo for free (dead HBM read of 2*guard lanes, negligible for real H).
    x_flat = x_nchw.reshape(N, cin, P).astype(jnp.bfloat16)
    gz = jnp.zeros((N, cin, guard), jnp.bfloat16)
    x_g = jnp.concatenate([gz, x_flat, gz], axis=2)           # (N, cin, ptot)

    # Horizontal-pad masks over output pixel columns (lane vectors, passed once).
    cols = (jnp.arange(P, dtype=jnp.int32) % W).reshape(1, P)
    not_left = (cols != 0).astype(jnp.float32)
    not_right = (cols != W - 1).astype(jnp.float32)

    # Fold BatchNorm (running stats) into conv0 / conv1 weights and biases.
    s0, t0 = _fold_bn(*params["bn0"])
    s1, t1 = _fold_bn(*params["bn1"])
    w0 = _taps(params["w0"], s0)                               # (9, cout, cin)  bf16
    b0 = (params["b0"] * s0 + t0).reshape(cout, 1).astype(jnp.float32)
    w1 = _taps(params["w1"], s1)                               # (9, cout, cout) bf16
    b1 = (params["b1"] * s1 + t1).reshape(cout, 1).astype(jnp.float32)
    w2 = _taps(params["w2"])                                   # (9, cout, cout) bf16
    b2 = params["b2"].reshape(cout, 1).astype(jnp.float32)

    # Derived VMEM budget: double-buffered in/out blocks + broadcast constants +
    # the inter-layer scratch, tile-padded, with 2x headroom for Mosaic
    # temporaries; capped below v7x's 64 MiB physical VMEM.
    need = (
        2 * (_pad_bytes((1, cin, ptot), jnp.bfloat16)
             + _pad_bytes((1, cout, P), jnp.float32))
        + 2 * (2 * _pad_bytes((1, P), jnp.float32)
               + _pad_bytes((9, cout, cin), jnp.bfloat16)
               + 2 * _pad_bytes((9, cout, cout), jnp.bfloat16)
               + 3 * _pad_bytes((cout, 1), jnp.float32))
        + _pad_bytes((cout, ptot), jnp.bfloat16))
    vmem_limit = int(min(60 << 20, max(4 << 20, 2 * need)))

    kernel = partial(_fused_initial_conv_kernel, W, guard, NEG_SLOPE)

    # TODO(synk): for large H, add a second grid axis over output row blocks
    # (3-row halo for the fused 3-conv stack) so scratch stays bounded on v7x.
    out_flat = pl.pallas_call(
        kernel,
        out_shape=jax.ShapeDtypeStruct((N, cout, P), jnp.float32),
        grid=(N,),
        in_specs=[
            pl.BlockSpec((1, cin, ptot), lambda n: (n, 0, 0)),    # x (bf16, guarded)
            pl.BlockSpec((1, P), lambda n: (0, 0)),               # not_left mask
            pl.BlockSpec((1, P), lambda n: (0, 0)),               # not_right mask
            pl.BlockSpec((9, cout, cin), lambda n: (0, 0, 0)),    # w0 (BN0-folded)
            pl.BlockSpec((cout, 1), lambda n: (0, 0)),            # b0 (BN0-folded)
            pl.BlockSpec((9, cout, cout), lambda n: (0, 0, 0)),   # w1 (BN1-folded)
            pl.BlockSpec((cout, 1), lambda n: (0, 0)),            # b1 (BN1-folded)
            pl.BlockSpec((9, cout, cout), lambda n: (0, 0, 0)),   # w2
            pl.BlockSpec((cout, 1), lambda n: (0, 0)),            # b2
        ],
        out_specs=pl.BlockSpec((1, cout, P), lambda n: (n, 0, 0)),
        scratch_shapes=[
            pltpu.VMEM((cout, ptot), jnp.bfloat16),   # guarded inter-layer activations
        ],
        compiler_params=pltpu.CompilerParams(
            dimension_semantics=("parallel",),        # batch axis -> megacore / 2 TCs
            vmem_limit_bytes=vmem_limit,              # derived per-shape, < 64 MiB
        ),
    )(x_g, not_left, not_right, w0, b0, w1, b1, w2, b2)

    # (N, Cout, P) -> NCHW is a free reshape in this layout.
    return out_flat.reshape(N, cout, H, W)


# --------------------- deterministic parameter init -------------------------

def init_params(key, cin, cout):
    ks = jax.random.split(key, 8)

    def conv_p(k, ci):
        k1, k2 = jax.random.split(k)
        fan_in = ci * 9
        w = jax.random.normal(k1, (cout, ci, 3, 3), jnp.float32) / jnp.sqrt(fan_in)
        b = 0.1 * jax.random.normal(k2, (cout,), jnp.float32)
        return w, b

    def bn_p(k):
        kk = jax.random.split(k, 4)
        gamma = 1.0 + 0.1 * jax.random.normal(kk[0], (cout,), jnp.float32)
        beta = 0.1 * jax.random.normal(kk[1], (cout,), jnp.float32)
        mean = 0.1 * jax.random.normal(kk[2], (cout,), jnp.float32)
        var = jnp.abs(jax.random.normal(kk[3], (cout,), jnp.float32)) + 0.5
        return gamma, beta, mean, var

    w0, b0 = conv_p(ks[0], cin)
    w1, b1 = conv_p(ks[1], cout)
    w2, b2 = conv_p(ks[2], cout)
    return dict(w0=w0, b0=b0, w1=w1, b1=b1, w2=w2, b2=b2,
                bn0=bn_p(ks[3]), bn1=bn_p(ks[4]))


# ------------------------ pure-JAX reference check ---------------------------

def reference_forward(x_nchw, params):
    def conv(x, w, b):
        y = lax.conv_general_dilated(x, w, (1, 1), [(1, 1), (1, 1)],
                                     dimension_numbers=("NCHW", "OIHW", "NCHW"))
        return y + b.reshape(1, -1, 1, 1)

    def bn(x, gamma, beta, mean, var):
        return ((x - mean.reshape(1, -1, 1, 1))
                / jnp.sqrt(var.reshape(1, -1, 1, 1) + EPS)
                * gamma.reshape(1, -1, 1, 1) + beta.reshape(1, -1, 1, 1))

    def lrelu(x):
        return jnp.where(x >= 0, x, NEG_SLOPE * x)

    y = conv(x_nchw, params["w0"], params["b0"])
    y = lrelu(bn(y, *params["bn0"]))
    y = conv(y, params["w1"], params["b1"])
    y = lrelu(bn(y, *params["bn1"]))
    y = conv(y, params["w2"], params["b2"])
    return y


# --------------------------------- main --------------------------------------

if __name__ == "__main__":
    N, CIN, COUT, H, W = 2, 4, 16, 16, 16
    key = jax.random.PRNGKey(0)
    kx, kp = jax.random.split(key)

    x = jax.random.normal(kx, (N, CIN, H, W), jnp.float32)   # NCHW, like PyTorch
    params = init_params(kp, CIN, COUT)

    out = initial_conv_forward(x, params)
    out = jax.block_until_ready(out)

    ref = reference_forward(x, params)
    assert out.shape == (N, COUT, H, W), out.shape
    # Tolerance accounts for bf16 quantization of the input stream, the
    # BN-folded weights and the inter-layer activations (MXU-native operands);
    # all matmul accumulation and the bias/mask/LeakyReLU tail run in f32.
    err = jnp.max(jnp.abs(out - ref))
    assert jnp.allclose(out, ref, rtol=3e-2, atol=3e-2), f"max abs err {err}"

    print("KERNEL_OK")
</pallas_src>

<mosaic_0001>
module attributes {stable_mosaic.version = 11 : i64} {
  func.func @_fused_initial_conv_kernel(%arg0: i32, %arg1: memref<1x4x512xbf16, #tpu.memory_space<vmem>>, %arg2: memref<1x256xf32, #tpu.memory_space<vmem>>, %arg3: memref<1x256xf32, #tpu.memory_space<vmem>>, %arg4: memref<9x16x4xbf16, #tpu.memory_space<vmem>>, %arg5: memref<16x1xf32, #tpu.memory_space<vmem>>, %arg6: memref<9x16x16xbf16, #tpu.memory_space<vmem>>, %arg7: memref<16x1xf32, #tpu.memory_space<vmem>>, %arg8: memref<9x16x16xbf16, #tpu.memory_space<vmem>>, %arg9: memref<16x1xf32, #tpu.memory_space<vmem>>, %arg10: memref<1x16x256xf32, #tpu.memory_space<vmem>>, %arg11: memref<16x512xbf16, #tpu.memory_space<vmem>>) attributes {dimension_semantics = [#tpu.dimension_semantics<parallel>], iteration_bounds = array<i64: 2>, scalar_prefetch = 0 : i64, scratch_operands = 1 : i64, tpu.core_type = #tpu.core_type<tc>, window_params = [{transform_indices = @transform_0, window_bounds = array<i64: 1, 4, 512>}, {pipeline_mode = #tpu.pipeline_mode<synchronous>, transform_indices = @transform_1, window_bounds = array<i64: 1, 256>}, {pipeline_mode = #tpu.pipeline_mode<synchronous>, transform_indices = @transform_2, window_bounds = array<i64: 1, 256>}, {pipeline_mode = #tpu.pipeline_mode<synchronous>, transform_indices = @transform_3, window_bounds = array<i64: 9, 16, 4>}, {pipeline_mode = #tpu.pipeline_mode<synchronous>, transform_indices = @transform_4, window_bounds = array<i64: 16, 1>}, {pipeline_mode = #tpu.pipeline_mode<synchronous>, transform_indices = @transform_5, window_bounds = array<i64: 9, 16, 16>}, {pipeline_mode = #tpu.pipeline_mode<synchronous>, transform_indices = @transform_6, window_bounds = array<i64: 16, 1>}, {pipeline_mode = #tpu.pipeline_mode<synchronous>, transform_indices = @transform_7, window_bounds = array<i64: 9, 16, 16>}, {pipeline_mode = #tpu.pipeline_mode<synchronous>, transform_indices = @transform_8, window_bounds = array<i64: 16, 1>}, {transform_indices = @transform_9, window_bounds = array<i64: 1, 16, 256>}]} {
    %cst = arith.constant 0.000000e+00 : bf16
    %0 = vector.broadcast %cst : bf16 to vector<16x128xbf16>
    %c0 = arith.constant 0 : index
    %c0_0 = arith.constant 0 : index
    %1 = vector.load %arg11[%c0, %c0_0] : memref<16x512xbf16, #tpu.memory_space<vmem>>, vector<16x128xbf16>
    tpu.vector_store %arg11[%c0, %c0_0], %0 {strides = array<i32>} : memref<16x512xbf16, #tpu.memory_space<vmem>>, vector<16x128xbf16>,
    %cst_1 = arith.constant 0.000000e+00 : bf16
    %2 = vector.broadcast %cst_1 : bf16 to vector<16x128xbf16>
    %c0_2 = arith.constant 0 : index
    %c384 = arith.constant 384 : index
    %3 = vector.load %arg11[%c0_2, %c384] : memref<16x512xbf16, #tpu.memory_space<vmem>>, vector<16x128xbf16>
    tpu.vector_store %arg11[%c0_2, %c384], %2 {strides = array<i32>} : memref<16x512xbf16, #tpu.memory_space<vmem>>, vector<16x128xbf16>,
    %c0_3 = arith.constant 0 : index
    %c0_4 = arith.constant 0 : index
    %4 = vector.load %arg2[%c0_3, %c0_4] : memref<1x256xf32, #tpu.memory_space<vmem>>, vector<1x256xf32>
    %c0_5 = arith.constant 0 : index
    %c0_6 = arith.constant 0 : index
    %5 = vector.load %arg3[%c0_5, %c0_6] : memref<1x256xf32, #tpu.memory_space<vmem>>, vector<1x256xf32>
    %c1 = arith.constant 1 : index
    %c0_7 = arith.constant 0 : index
    %c0_8 = arith.constant 0 : index
    %6 = vector.load %arg4[%c1, %c0_7, %c0_8] : memref<9x16x4xbf16, #tpu.memory_space<vmem>>, vector<1x16x4xbf16>
    %7 = vector.shape_cast %6 : vector<1x16x4xbf16> to vector<16x4xbf16>
    %c0_9 = arith.constant 0 : index
    %c0_10 = arith.constant 0 : index
    %c112 = arith.constant 112 : index
    %8 = vector.load %arg1[%c0_9, %c0_10, %c112] : memref<1x4x512xbf16, #tpu.memory_space<vmem>>, vector<1x4x256xbf16>
    %9 = vector.shape_cast %8 : vector<1x4x256xbf16> to vector<4x256xbf16>
    %cst_11 = arith.constant dense<0.000000e+00> : vector<16x256xf32>
    %10 = tpu.matmul %7, %9, %cst_11 {dimension_numbers = #tpu.dot_dimension_numbers<[1], [0], [0], [1], [0, 0, 1, 1], [], []>} : vector<16x4xbf16>, vector<4x256xbf16>, vector<16x256xf32> -> vector<16x256xf32>
    %c4 = arith.constant 4 : index
    %c0_12 = arith.constant 0 : index
    %c0_13 = arith.constant 0 : index
    %11 = vector.load %arg4[%c4, %c0_12, %c0_13] : memref<9x16x4xbf16, #tpu.memory_space<vmem>>, vector<1x16x4xbf16>
    %12 = vector.shape_cast %11 : vector<1x16x4xbf16> to vector<16x4xbf16>
    %c0_14 = arith.constant 0 : index
    %c0_15 = arith.constant 0 : index
    %c128 = arith.constant 128 : index
    %13 = vector.load %arg1[%c0_14, %c0_15, %c128] : memref<1x4x512xbf16, #tpu.memory_space<vmem>>, vector<1x4x256xbf16>
    %14 = vector.shape_cast %13 : vector<1x4x256xbf16> to vector<4x256xbf16>
    %cst_16 = arith.constant dense<0.000000e+00> : vector<16x256xf32>
    %15 = tpu.matmul %12, %14, %cst_16 {dimension_numbers = #tpu.dot_dimension_numbers<[1], [0], [0], [1], [0, 0, 1, 1], [], []>} : vector<16x4xbf16>, vector<4x256xbf16>, vector<16x256xf32> -> vector<16x256xf32>
    %16 = arith.addf %10, %15 : vector<16x256xf32>
    %c7 = arith.constant 7 : index
    %c0_17 = arith.constant 0 : index
    %c0_18 = arith.constant 0 : index
    %17 = vector.load %arg4[%c7, %c0_17, %c0_18] : memref<9x16x4xbf16, #tpu.memory_space<vmem>>, vector<1x16x4xbf16>
    %18 = vector.shape_cast %17 : vector<1x16x4xbf16> to vector<16x4xbf16>
    %c0_19 = arith.constant 0 : index
    %c0_20 = arith.constant 0 : index
    %c144 = arith.constant 144 : index
    %19 = vector.load %arg1[%c0_19, %c0_20, %c144] : memref<1x4x512xbf16, #tpu.memory_space<vmem>>, vector<1x4x256xbf16>
    %20 = vector.shape_cast %19 : vector<1x4x256xbf16> to vector<4x256xbf16>
    %cst_21 = arith.constant dense<0.000000e+00> : vector<16x256xf32>
    %21 = tpu.matmul %18, %20, %cst_21 {dimension_numbers = #tpu.dot_dimension_numbers<[1], [0], [0], [1], [0, 0, 1, 1], [], []>} : vector<16x4xbf16>, vector<4x256xbf16>, vector<16x256xf32> -> vector<16x256xf32>
    %22 = arith.addf %16, %21 : vector<16x256xf32>
    %c0_22 = arith.constant 0 : index
    %c0_23 = arith.constant 0 : index
    %c0_24 = arith.constant 0 : index
    %23 = vector.load %arg4[%c0_22, %c0_23, %c0_24] : memref<9x16x4xbf16, #tpu.memory_space<vmem>>, vector<1x16x4xbf16>
    %24 = vector.shape_cast %23 : vector<1x16x4xbf16> to vector<16x4xbf16>
    %c0_25 = arith.constant 0 : index
    %c0_26 = arith.constant 0 : index
    %c111 = arith.constant 111 : index
    %25 = vector.load %arg1[%c0_25, %c0_26, %c111] : memref<1x4x512xbf16, #tpu.memory_space<vmem>>, vector<1x4x256xbf16>
    %26 = vector.shape_cast %25 : vector<1x4x256xbf16> to vector<4x256xbf16>
    %cst_27 = arith.constant dense<0.000000e+00> : vector<16x256xf32>
    %27 = tpu.matmul %24, %26, %cst_27 {dimension_numbers = #tpu.dot_dimension_numbers<[1], [0], [0], [1], [0, 0, 1, 1], [], []>} : vector<16x4xbf16>, vector<4x256xbf16>, vector<16x256xf32> -> vector<16x256xf32>
    %c3 = arith.constant 3 : index
    %c0_28 = arith.constant 0 : index
    %c0_29 = arith.constant 0 : index
    %28 = vector.load %arg4[%c3, %c0_28, %c0_29] : memref<9x16x4xbf16, #tpu.memory_space<vmem>>, vector<1x16x4xbf16>
    %29 = vector.shape_cast %28 : vector<1x16x4xbf16> to vector<16x4xbf16>
    %c0_30 = arith.constant 0 : index
    %c0_31 = arith.constant 0 : index
    %c127 = arith.constant 127 : index
    %30 = vector.load %arg1[%c0_30, %c0_31, %c127] : memref<1x4x512xbf16, #tpu.memory_space<vmem>>, vector<1x4x256xbf16>
    %31 = vector.shape_cast %30 : vector<1x4x256xbf16> to vector<4x256xbf16>
    %cst_32 = arith.constant dense<0.000000e+00> : vector<16x256xf32>
    %32 = tpu.matmul %29, %31, %cst_32 {dimension_numbers = #tpu.dot_dimension_numbers<[1], [0], [0], [1], [0, 0, 1, 1], [], []>} : vector<16x4xbf16>, vector<4x256xbf16>, vector<16x256xf32> -> vector<16x256xf32>
    %33 = arith.addf %27, %32 : vector<16x256xf32>
    %c6 = arith.constant 6 : index
    %c0_33 = arith.constant 0 : index
    %c0_34 = arith.constant 0 : index
    %34 = vector.load %arg4[%c6, %c0_33, %c0_34] : memref<9x16x4xbf16, #tpu.memory_space<vmem>>, vector<1x16x4xbf16>
    %35 = vector.shape_cast %34 : vector<1x16x4xbf16> to vector<16x4xbf16>
    %c0_35 = arith.constant 0 : index
    %c0_36 = arith.constant 0 : index
    %c143 = arith.constant 143 : index
    %36 = vector.load %arg1[%c0_35, %c0_36, %c143] : memref<1x4x512xbf16, #tpu.memory_space<vmem>>, vector<1x4x256xbf16>
    %37 = vector.shape_cast %36 : vector<1x4x256xbf16> to vector<4x256xbf16>
    %cst_37 = arith.constant dense<0.000000e+00> : vector<16x256xf32>
    %38 = tpu.matmul %35, %37, %cst_37 {dimension_numbers = #tpu.dot_dimension_numbers<[1], [0], [0], [1], [0, 0, 1, 1], [], []>} : vector<16x4xbf16>, vector<4x256xbf16>, vector<16x256xf32> -> vector<16x256xf32>
    %39 = arith.addf %33, %38 : vector<16x256xf32>
    %c2 = arith.constant 2 : index
    %c0_38 = arith.constant 0 : index
    %c0_39 = arith.constant 0 : index
    %40 = vector.load %arg4[%c2, %c0_38, %c0_39] : memref<9x16x4xbf16, #tpu.memory_space<vmem>>, vector<1x16x4xbf16>
    %41 = vector.shape_cast %40 : vector<1x16x4xbf16> to vector<16x4xbf16>
    %c0_40 = arith.constant 0 : index
    %c0_41 = arith.constant 0 : index
    %c113 = arith.constant 113 : index
    %42 = vector.load %arg1[%c0_40, %c0_41, %c113] : memref<1x4x512xbf16, #tpu.memory_space<vmem>>, vector<1x4x256xbf16>
    %43 = vector.shape_cast %42 : vector<1x4x256xbf16> to vector<4x256xbf16>
    %cst_42 = arith.constant dense<0.000000e+00> : vector<16x256xf32>
    %44 = tpu.matmul %41, %43, %cst_42 {dimension_numbers = #tpu.dot_dimension_numbers<[1], [0], [0], [1], [0, 0, 1, 1], [], []>} : vector<16x4xbf16>, vector<4x256xbf16>, vector<16x256xf32> -> vector<16x256xf32>
    %c5 = arith.constant 5 : index
    %c0_43 = arith.constant 0 : index
    %c0_44 = arith.constant 0 : index
    %45 = vector.load %arg4[%c5, %c0_43, %c0_44] : memref<9x16x4xbf16, #tpu.memory_space<vmem>>, vector<1x16x4xbf16>
    %46 = vector.shape_cast %45 : vector<1x16x4xbf16> to vector<16x4xbf16>
    %c0_45 = arith.constant 0 : index
    %c0_46 = arith.constant 0 : index
    %c129 = arith.constant 129 : index
    %47 = vector.load %arg1[%c0_45, %c0_46, %c129] : memref<1x4x512xbf16, #tpu.memory_space<vmem>>, vector<1x4x256xbf16>
    %48 = vector.shape_cast %47 : vector<1x4x256xbf16> to vector<4x256xbf16>
    %cst_47 = arith.constant dense<0.000000e+00> : vector<16x256xf32>
    %49 = tpu.matmul %46, %48, %cst_47 {dimension_numbers = #tpu.dot_dimension_numbers<[1], [0], [0], [1], [0, 0, 1, 1], [], []>} : vector<16x4xbf16>, vector<4x256xbf16>, vector<16x256xf32> -> vector<16x256xf32>
    %50 = arith.addf %44, %49 : vector<16x256xf32>
    %c8 = arith.constant 8 : index
    %c0_48 = arith.constant 0 : index
    %c0_49 = arith.constant 0 : index
    %51 = vector.load %arg4[%c8, %c0_48, %c0_49] : memref<9x16x4xbf16, #tpu.memory_space<vmem>>, vector<1x16x4xbf16>
    %52 = vector.shape_cast %51 : vector<1x16x4xbf16> to vector<16x4xbf16>
    %c0_50 = arith.constant 0 : index
    %c0_51 = arith.constant 0 : index
    %c145 = arith.constant 145 : index
    %53 = vector.load %arg1[%c0_50, %c0_51, %c145] : memref<1x4x512xbf16, #tpu.memory_space<vmem>>, vector<1x4x256xbf16>
    %54 = vector.shape_cast %53 : vector<1x4x256xbf16> to vector<4x256xbf16>
    %cst_52 = arith.constant dense<0.000000e+00> : vector<16x256xf32>
    %55 = tpu.matmul %52, %54, %cst_52 {dimension_numbers = #tpu.dot_dimension_numbers<[1], [0], [0], [1], [0, 0, 1, 1], [], []>} : vector<16x4xbf16>, vector<4x256xbf16>, vector<16x256xf32> -> vector<16x256xf32>
    %56 = arith.addf %50, %55 : vector<16x256xf32>
    %57 = vector.broadcast %4 : vector<1x256xf32> to vector<16x256xf32>
    %58 = arith.mulf %39, %57 : vector<16x256xf32>
    %59 = arith.addf %22, %58 : vector<16x256xf32>
    %60 = vector.broadcast %5 : vector<1x256xf32> to vector<16x256xf32>
    %61 = arith.mulf %56, %60 : vector<16x256xf32>
    %62 = arith.addf %59, %61 : vector<16x256xf32>
    %c0_53 = arith.constant 0 : index
    %c0_54 = arith.constant 0 : index
    %63 = vector.load %arg5[%c0_53, %c0_54] : memref<16x1xf32, #tpu.memory_space<vmem>>, vector<16x1xf32>
    %64 = vector.broadcast %63 : vector<16x1xf32> to vector<16x256xf32>
    %65 = arith.addf %62, %64 : vector<16x256xf32>
    %cst_55 = arith.constant 0.000000e+00 : f32
    %66 = vector.broadcast %cst_55 : f32 to vector<16x256xf32>
    %67 = arith.cmpf oge, %65, %66 : vector<16x256xf32>
    %cst_56 = arith.constant 0.00999999977 : f32
    %68 = vector.broadcast %cst_56 : f32 to vector<16x256xf32>
    %69 = arith.mulf %68, %65 : vector<16x256xf32>
    %70 = arith.select %67, %65, %69 : vector<16x256xi1>, vector<16x256xf32>
    %71 = arith.truncf %70 : vector<16x256xf32> to vector<16x256xbf16>
    %c0_57 = arith.constant 0 : index
    %c128_58 = arith.constant 128 : index
    %72 = vector.load %arg11[%c0_57, %c128_58] : memref<16x512xbf16, #tpu.memory_space<vmem>>, vector<16x256xbf16>
    tpu.vector_store %arg11[%c0_57, %c128_58], %71 {strides = array<i32>} : memref<16x512xbf16, #tpu.memory_space<vmem>>, vector<16x256xbf16>,
    %c1_59 = arith.constant 1 : index
    %c0_60 = arith.constant 0 : index
    %c0_61 = arith.constant 0 : index
    %73 = vector.load %arg6[%c1_59, %c0_60, %c0_61] : memref<9x16x16xbf16, #tpu.memory_space<vmem>>, vector<1x16x16xbf16>
    %74 = vector.shape_cast %73 : vector<1x16x16xbf16> to vector<16x16xbf16>
    %c0_62 = arith.constant 0 : index
    %c112_63 = arith.constant 112 : index
    %75 = vector.load %arg11[%c0_62, %c112_63] : memref<16x512xbf16, #tpu.memory_space<vmem>>, vector<16x256xbf16>
    %cst_64 = arith.constant dense<0.000000e+00> : vector<16x256xf32>
    %76 = tpu.matmul %74, %75, %cst_64 {dimension_numbers = #tpu.dot_dimension_numbers<[1], [0], [0], [1], [0, 0, 1, 1], [], []>} : vector<16x16xbf16>, vector<16x256xbf16>, vector<16x256xf32> -> vector<16x256xf32>
    %c4_65 = arith.constant 4 : index
    %c0_66 = arith.constant 0 : index
    %c0_67 = arith.constant 0 : index
    %77 = vector.load %arg6[%c4_65, %c0_66, %c0_67] : memref<9x16x16xbf16, #tpu.memory_space<vmem>>, vector<1x16x16xbf16>
    %78 = vector.shape_cast %77 : vector<1x16x16xbf16> to vector<16x16xbf16>
    %c0_68 = arith.constant 0 : index
    %c128_69 = arith.constant 128 : index
    %79 = vector.load %arg11[%c0_68, %c128_69] : memref<16x512xbf16, #tpu.memory_space<vmem>>, vector<16x256xbf16>
    %cst_70 = arith.constant dense<0.000000e+00> : vector<16x256xf32>
    %80 = tpu.matmul %78, %79, %cst_70 {dimension_numbers = #tpu.dot_dimension_numbers<[1], [0], [0], [1], [0, 0, 1, 1], [], []>} : vector<16x16xbf16>, vector<16x256xbf16>, vector<16x256xf32> -> vector<16x256xf32>
    %81 = arith.addf %76, %80 : vector<16x256xf32>
    %c7_71 = arith.constant 7 : index
    %c0_72 = arith.constant 0 : index
    %c0_73 = arith.constant 0 : index
    %82 = vector.load %arg6[%c7_71, %c0_72, %c0_73] : memref<9x16x16xbf16, #tpu.memory_space<vmem>>, vector<1x16x16xbf16>
    %83 = vector.shape_cast %82 : vector<1x16x16xbf16> to vector<16x16xbf16>
    %c0_74 = arith.constant 0 : index
    %c144_75 = arith.constant 144 : index
    %84 = vector.load %arg11[%c0_74, %c144_75] : memref<16x512xbf16, #tpu.memory_space<vmem>>, vector<16x256xbf16>
    %cst_76 = arith.constant dense<0.000000e+00> : vector<16x256xf32>
    %85 = tpu.matmul %83, %84, %cst_76 {dimension_numbers = #tpu.dot_dimension_numbers<[1], [0], [0], [1], [0, 0, 1, 1], [], []>} : vector<16x16xbf16>, vector<16x256xbf16>, vector<16x256xf32> -> vector<16x256xf32>
    %86 = arith.addf %81, %85 : vector<16x256xf32>
    %c0_77 = arith.constant 0 : index
    %c0_78 = arith.constant 0 : index
    %c0_79 = arith.constant 0 : index
    %87 = vector.load %arg6[%c0_77, %c0_78, %c0_79] : memref<9x16x16xbf16, #tpu.memory_space<vmem>>, vector<1x16x16xbf16>
    %88 = vector.shape_cast %87 : vector<1x16x16xbf16> to vector<16x16xbf16>
    %c0_80 = arith.constant 0 : index
    %c111_81 = arith.constant 111 : index
    %89 = vector.load %arg11[%c0_80, %c111_81] : memref<16x512xbf16, #tpu.memory_space<vmem>>, vector<16x256xbf16>
    %cst_82 = arith.constant dense<0.000000e+00> : vector<16x256xf32>
    %90 = tpu.matmul %88, %89, %cst_82 {dimension_numbers = #tpu.dot_dimension_numbers<[1], [0], [0], [1], [0, 0, 1, 1], [], []>} : vector<16x16xbf16>, vector<16x256xbf16>, vector<16x256xf32> -> vector<16x256xf32>
    %c3_83 = arith.constant 3 : index
    %c0_84 = arith.constant 0 : index
    %c0_85 = arith.constant 0 : index
    %91 = vector.load %arg6[%c3_83, %c0_84, %c0_85] : memref<9x16x16xbf16, #tpu.memory_space<vmem>>, vector<1x16x16xbf16>
    %92 = vector.shape_cast %91 : vector<1x16x16xbf16> to vector<16x16xbf16>
    %c0_86 = arith.constant 0 : index
    %c127_87 = arith.constant 127 : index
    %93 = vector.load %arg11[%c0_86, %c127_87] : memref<16x512xbf16, #tpu.memory_space<vmem>>, vector<16x256xbf16>
    %cst_88 = arith.constant dense<0.000000e+00> : vector<16x256xf32>
    %94 = tpu.matmul %92, %93, %cst_88 {dimension_numbers = #tpu.dot_dimension_numbers<[1], [0], [0], [1], [0, 0, 1, 1], [], []>} : vector<16x16xbf16>, vector<16x256xbf16>, vector<16x256xf32> -> vector<16x256xf32>
    %95 = arith.addf %90, %94 : vector<16x256xf32>
    %c6_89 = arith.constant 6 : index
    %c0_90 = arith.constant 0 : index
    %c0_91 = arith.constant 0 : index
    %96 = vector.load %arg6[%c6_89, %c0_90, %c0_91] : memref<9x16x16xbf16, #tpu.memory_space<vmem>>, vector<1x16x16xbf16>
    %97 = vector.shape_cast %96 : vector<1x16x16xbf16> to vector<16x16xbf16>
    %c0_92 = arith.constant 0 : index
    %c143_93 = arith.constant 143 : index
    %98 = vector.load %arg11[%c0_92, %c143_93] : memref<16x512xbf16, #tpu.memory_space<vmem>>, vector<16x256xbf16>
    %cst_94 = arith.constant dense<0.000000e+00> : vector<16x256xf32>
    %99 = tpu.matmul %97, %98, %cst_94 {dimension_numbers = #tpu.dot_dimension_numbers<[1], [0], [0], [1], [0, 0, 1, 1], [], []>} : vector<16x16xbf16>, vector<16x256xbf16>, vector<16x256xf32> -> vector<16x256xf32>
    %100 = arith.addf %95, %99 : vector<16x256xf32>
    %c2_95 = arith.constant 2 : index
    %c0_96 = arith.constant 0 : index
    %c0_97 = arith.constant 0 : index
    %101 = vector.load %arg6[%c2_95, %c0_96, %c0_97] : memref<9x16x16xbf16, #tpu.memory_space<vmem>>, vector<1x16x16xbf16>
    %102 = vector.shape_cast %101 : vector<1x16x16xbf16> to vector<16x16xbf16>
    %c0_98 = arith.constant 0 : index
    %c113_99 = arith.constant 113 : index
    %103 = vector.load %arg11[%c0_98, %c113_99] : memref<16x512xbf16, #tpu.memory_space<vmem>>, vector<16x256xbf16>
    %cst_100 = arith.constant dense<0.000000e+00> : vector<16x256xf32>
    %104 = tpu.matmul %102, %103, %cst_100 {dimension_numbers = #tpu.dot_dimension_numbers<[1], [0], [0], [1], [0, 0, 1, 1], [], []>} : vector<16x16xbf16>, vector<16x256xbf16>, vector<16x256xf32> -> vector<16x256xf32>
    %c5_101 = arith.constant 5 : index
    %c0_102 = arith.constant 0 : index
    %c0_103 = arith.constant 0 : index
    %105 = vector.load %arg6[%c5_101, %c0_102, %c0_103] : memref<9x16x16xbf16, #tpu.memory_space<vmem>>, vector<1x16x16xbf16>
    %106 = vector.shape_cast %105 : vector<1x16x16xbf16> to vector<16x16xbf16>
    %c0_104 = arith.constant 0 : index
    %c129_105 = arith.constant 129 : index
    %107 = vector.load %arg11[%c0_104, %c129_105] : memref<16x512xbf16, #tpu.memory_space<vmem>>, vector<16x256xbf16>
    %cst_106 = arith.constant dense<0.000000e+00> : vector<16x256xf32>
    %108 = tpu.matmul %106, %107, %cst_106 {dimension_numbers = #tpu.dot_dimension_numbers<[1], [0], [0], [1], [0, 0, 1, 1], [], []>} : vector<16x16xbf16>, vector<16x256xbf16>, vector<16x256xf32> -> vector<16x256xf32>
    %109 = arith.addf %104, %108 : vector<16x256xf32>
    %c8_107 = arith.constant 8 : index
    %c0_108 = arith.constant 0 : index
    %c0_109 = arith.constant 0 : index
    %110 = vector.load %arg6[%c8_107, %c0_108, %c0_109] : memref<9x16x16xbf16, #tpu.memory_space<vmem>>, vector<1x16x16xbf16>
    %111 = vector.shape_cast %110 : vector<1x16x16xbf16> to vector<16x16xbf16>
    %c0_110 = arith.constant 0 : index
    %c145_111 = arith.constant 145 : index
    %112 = vector.load %arg11[%c0_110, %c145_111] : memref<16x512xbf16, #tpu.memory_space<vmem>>, vector<16x256xbf16>
    %cst_112 = arith.constant dense<0.000000e+00> : vector<16x256xf32>
    %113 = tpu.matmul %111, %112, %cst_112 {dimension_numbers = #tpu.dot_dimension_numbers<[1], [0], [0], [1], [0, 0, 1, 1], [], []>} : vector<16x16xbf16>, vector<16x256xbf16>, vector<16x256xf32> -> vector<16x256xf32>
    %114 = arith.addf %109, %113 : vector<16x256xf32>
    %115 = vector.broadcast %4 : vector<1x256xf32> to vector<16x256xf32>
    %116 = arith.mulf %100, %115 : vector<16x256xf32>
    %117 = arith.addf %86, %116 : vector<16x256xf32>
    %118 = vector.broadcast %5 : vector<1x256xf32> to vector<16x256xf32>
    %119 = arith.mulf %114, %118 : vector<16x256xf32>
    %120 = arith.addf %117, %119 : vector<16x256xf32>
    %c0_113 = arith.constant 0 : index
    %c0_114 = arith.constant 0 : index
    %121 = vector.load %arg7[%c0_113, %c0_114] : memref<16x1xf32, #tpu.memory_space<vmem>>, vector<16x1xf32>
    %122 = vector.broadcast %121 : vector<16x1xf32> to vector<16x256xf32>
    %123 = arith.addf %120, %122 : vector<16x256xf32>
    %cst_115 = arith.constant 0.000000e+00 : f32
    %124 = vector.broadcast %cst_115 : f32 to vector<16x256xf32>
    %125 = arith.cmpf oge, %123, %124 : vector<16x256xf32>
    %cst_116 = arith.constant 0.00999999977 : f32
    %126 = vector.broadcast %cst_116 : f32 to vector<16x256xf32>
    %127 = arith.mulf %126, %123 : vector<16x256xf32>
    %128 = arith.select %125, %123, %127 : vector<16x256xi1>, vector<16x256xf32>
    %129 = arith.truncf %128 : vector<16x256xf32> to vector<16x256xbf16>
    %c0_117 = arith.constant 0 : index
    %c128_118 = arith.constant 128 : index
    %130 = vector.load %arg11[%c0_117, %c128_118] : memref<16x512xbf16, #tpu.memory_space<vmem>>, vector<16x256xbf16>
    tpu.vector_store %arg11[%c0_117, %c128_118], %129 {strides = array<i32>} : memref<16x512xbf16, #tpu.memory_space<vmem>>, vector<16x256xbf16>,
    %c1_119 = arith.constant 1 : index
    %c0_120 = arith.constant 0 : index
    %c0_121 = arith.constant 0 : index
    %131 = vector.load %arg8[%c1_119, %c0_120, %c0_121] : memref<9x16x16xbf16, #tpu.memory_space<vmem>>, vector<1x16x16xbf16>
    %132 = vector.shape_cast %131 : vector<1x16x16xbf16> to vector<16x16xbf16>
    %c0_122 = arith.constant 0 : index
    %c112_123 = arith.constant 112 : index
    %133 = vector.load %arg11[%c0_122, %c112_123] : memref<16x512xbf16, #tpu.memory_space<vmem>>, vector<16x256xbf16>
    %cst_124 = arith.constant dense<0.000000e+00> : vector<16x256xf32>
    %134 = tpu.matmul %132, %133, %cst_124 {dimension_numbers = #tpu.dot_dimension_numbers<[1], [0], [0], [1], [0, 0, 1, 1], [], []>} : vector<16x16xbf16>, vector<16x256xbf16>, vector<16x256xf32> -> vector<16x256xf32>
    %c4_125 = arith.constant 4 : index
    %c0_126 = arith.constant 0 : index
    %c0_127 = arith.constant 0 : index
    %135 = vector.load %arg8[%c4_125, %c0_126, %c0_127] : memref<9x16x16xbf16, #tpu.memory_space<vmem>>, vector<1x16x16xbf16>
    %136 = vector.shape_cast %135 : vector<1x16x16xbf16> to vector<16x16xbf16>
    %c0_128 = arith.constant 0 : index
    %c128_129 = arith.constant 128 : index
    %137 = vector.load %arg11[%c0_128, %c128_129] : memref<16x512xbf16, #tpu.memory_space<vmem>>, vector<16x256xbf16>
    %cst_130 = arith.constant dense<0.000000e+00> : vector<16x256xf32>
    %138 = tpu.matmul %136, %137, %cst_130 {dimension_numbers = #tpu.dot_dimension_numbers<[1], [0], [0], [1], [0, 0, 1, 1], [], []>} : vector<16x16xbf16>, vector<16x256xbf16>, vector<16x256xf32> -> vector<16x256xf32>
    %139 = arith.addf %134, %138 : vector<16x256xf32>
    %c7_131 = arith.constant 7 : index
    %c0_132 = arith.constant 0 : index
    %c0_133 = arith.constant 0 : index
    %140 = vector.load %arg8[%c7_131, %c0_132, %c0_133] : memref<9x16x16xbf16, #tpu.memory_space<vmem>>, vector<1x16x16xbf16>
    %141 = vector.shape_cast %140 : vector<1x16x16xbf16> to vector<16x16xbf16>
    %c0_134 = arith.constant 0 : index
    %c144_135 = arith.constant 144 : index
    %142 = vector.load %arg11[%c0_134, %c144_135] : memref<16x512xbf16, #tpu.memory_space<vmem>>, vector<16x256xbf16>
    %cst_136 = arith.constant dense<0.000000e+00> : vector<16x256xf32>
    %143 = tpu.matmul %141, %142, %cst_136 {dimension_numbers = #tpu.dot_dimension_numbers<[1], [0], [0], [1], [0, 0, 1, 1], [], []>} : vector<16x16xbf16>, vector<16x256xbf16>, vector<16x256xf32> -> vector<16x256xf32>
    %144 = arith.addf %139, %143 : vector<16x256xf32>
    %c0_137 = arith.constant 0 : index
    %c0_138 = arith.constant 0 : index
    %c0_139 = arith.constant 0 : index
    %145 = vector.load %arg8[%c0_137, %c0_138, %c0_139] : memref<9x16x16xbf16, #tpu.memory_space<vmem>>, vector<1x16x16xbf16>
    %146 = vector.shape_cast %145 : vector<1x16x16xbf16> to vector<16x16xbf16>
    %c0_140 = arith.constant 0 : index
    %c111_141 = arith.constant 111 : index
    %147 = vector.load %arg11[%c0_140, %c111_141] : memref<16x512xbf16, #tpu.memory_space<vmem>>, vector<16x256xbf16>
    %cst_142 = arith.constant dense<0.000000e+00> : vector<16x256xf32>
    %148 = tpu.matmul %146, %147, %cst_142 {dimension_numbers = #tpu.dot_dimension_numbers<[1], [0], [0], [1], [0, 0, 1, 1], [], []>} : vector<16x16xbf16>, vector<16x256xbf16>, vector<16x256xf32> -> vector<16x256xf32>
    %c3_143 = arith.constant 3 : index
    %c0_144 = arith.constant 0 : index
    %c0_145 = arith.constant 0 : index
    %149 = vector.load %arg8[%c3_143, %c0_144, %c0_145] : memref<9x16x16xbf16, #tpu.memory_space<vmem>>, vector<1x16x16xbf16>
    %150 = vector.shape_cast %149 : vector<1x16x16xbf16> to vector<16x16xbf16>
    %c0_146 = arith.constant 0 : index
    %c127_147 = arith.constant 127 : index
    %151 = vector.load %arg11[%c0_146, %c127_147] : memref<16x512xbf16, #tpu.memory_space<vmem>>, vector<16x256xbf16>
    %cst_148 = arith.constant dense<0.000000e+00> : vector<16x256xf32>
    %152 = tpu.matmul %150, %151, %cst_148 {dimension_numbers = #tpu.dot_dimension_numbers<[1], [0], [0], [1], [0, 0, 1, 1], [], []>} : vector<16x16xbf16>, vector<16x256xbf16>, vector<16x256xf32> -> vector<16x256xf32>
    %153 = arith.addf %148, %152 : vector<16x256xf32>
    %c6_149 = arith.constant 6 : index
    %c0_150 = arith.constant 0 : index
    %c0_151 = arith.constant 0 : index
    %154 = vector.load %arg8[%c6_149, %c0_150, %c0_151] : memref<9x16x16xbf16, #tpu.memory_space<vmem>>, vector<1x16x16xbf16>
    %155 = vector.shape_cast %154 : vector<1x16x16xbf16> to vector<16x16xbf16>
    %c0_152 = arith.constant 0 : index
    %c143_153 = arith.constant 143 : index
    %156 = vector.load %arg11[%c0_152, %c143_153] : memref<16x512xbf16, #tpu.memory_space<vmem>>, vector<16x256xbf16>
    %cst_154 = arith.constant dense<0.000000e+00> : vector<16x256xf32>
    %157 = tpu.matmul %155, %156, %cst_154 {dimension_numbers = #tpu.dot_dimension_numbers<[1], [0], [0], [1], [0, 0, 1, 1], [], []>} : vector<16x16xbf16>, vector<16x256xbf16>, vector<16x256xf32> -> vector<16x256xf32>
    %158 = arith.addf %153, %157 : vector<16x256xf32>
    %c2_155 = arith.constant 2 : index
    %c0_156 = arith.constant 0 : index
    %c0_157 = arith.constant 0 : index
    %159 = vector.load %arg8[%c2_155, %c0_156, %c0_157] : memref<9x16x16xbf16, #tpu.memory_space<vmem>>, vector<1x16x16xbf16>
    %160 = vector.shape_cast %159 : vector<1x16x16xbf16> to vector<16x16xbf16>
    %c0_158 = arith.constant 0 : index
    %c113_159 = arith.constant 113 : index
    %161 = vector.load %arg11[%c0_158, %c113_159] : memref<16x512xbf16, #tpu.memory_space<vmem>>, vector<16x256xbf16>
    %cst_160 = arith.constant dense<0.000000e+00> : vector<16x256xf32>
    %162 = tpu.matmul %160, %161, %cst_160 {dimension_numbers = #tpu.dot_dimension_numbers<[1], [0], [0], [1], [0, 0, 1, 1], [], []>} : vector<16x16xbf16>, vector<16x256xbf16>, vector<16x256xf32> -> vector<16x256xf32>
    %c5_161 = arith.constant 5 : index
    %c0_162 = arith.constant 0 : index
    %c0_163 = arith.constant 0 : index
    %163 = vector.load %arg8[%c5_161, %c0_162, %c0_163] : memref<9x16x16xbf16, #tpu.memory_space<vmem>>, vector<1x16x16xbf16>
    %164 = vector.shape_cast %163 : vector<1x16x16xbf16> to vector<16x16xbf16>
    %c0_164 = arith.constant 0 : index
    %c129_165 = arith.constant 129 : index
    %165 = vector.load %arg11[%c0_164, %c129_165] : memref<16x512xbf16, #tpu.memory_space<vmem>>, vector<16x256xbf16>
    %cst_166 = arith.constant dense<0.000000e+00> : vector<16x256xf32>
    %166 = tpu.matmul %164, %165, %cst_166 {dimension_numbers = #tpu.dot_dimension_numbers<[1], [0], [0], [1], [0, 0, 1, 1], [], []>} : vector<16x16xbf16>, vector<16x256xbf16>, vector<16x256xf32> -> vector<16x256xf32>
    %167 = arith.addf %162, %166 : vector<16x256xf32>
    %c8_167 = arith.constant 8 : index
    %c0_168 = arith.constant 0 : index
    %c0_169 = arith.constant 0 : index
    %168 = vector.load %arg8[%c8_167, %c0_168, %c0_169] : memref<9x16x16xbf16, #tpu.memory_space<vmem>>, vector<1x16x16xbf16>
    %169 = vector.shape_cast %168 : vector<1x16x16xbf16> to vector<16x16xbf16>
    %c0_170 = arith.constant 0 : index
    %c145_171 = arith.constant 145 : index
    %170 = vector.load %arg11[%c0_170, %c145_171] : memref<16x512xbf16, #tpu.memory_space<vmem>>, vector<16x256xbf16>
    %cst_172 = arith.constant dense<0.000000e+00> : vector<16x256xf32>
    %171 = tpu.matmul %169, %170, %cst_172 {dimension_numbers = #tpu.dot_dimension_numbers<[1], [0], [0], [1], [0, 0, 1, 1], [], []>} : vector<16x16xbf16>, vector<16x256xbf16>, vector<16x256xf32> -> vector<16x256xf32>
    %172 = arith.addf %167, %171 : vector<16x256xf32>
    %173 = vector.broadcast %4 : vector<1x256xf32> to vector<16x256xf32>
    %174 = arith.mulf %158, %173 : vector<16x256xf32>
    %175 = arith.addf %144, %174 : vector<16x256xf32>
    %176 = vector.broadcast %5 : vector<1x256xf32> to vector<16x256xf32>
    %177 = arith.mulf %172, %176 : vector<16x256xf32>
    %178 = arith.addf %175, %177 : vector<16x256xf32>
    %c0_173 = arith.constant 0 : index
    %c0_174 = arith.constant 0 : index
    %179 = vector.load %arg9[%c0_173, %c0_174] : memref<16x1xf32, #tpu.memory_space<vmem>>, vector<16x1xf32>
    %180 = vector.broadcast %179 : vector<16x1xf32> to vector<16x256xf32>
    %181 = arith.addf %178, %180 : vector<16x256xf32>
    %c0_175 = arith.constant 0 : index
    %c0_176 = arith.constant 0 : index
    %c0_177 = arith.constant 0 : index
    %182 = vector.load %arg10[%c0_175, %c0_176, %c0_177] : memref<1x16x256xf32, #tpu.memory_space<vmem>>, vector<1x16x256xf32>
    %183 = vector.shape_cast %182 : vector<1x16x256xf32> to vector<16x256xf32>
    %184 = vector.shape_cast %181 : vector<16x256xf32> to vector<1x16x256xf32>
    tpu.vector_store %arg10[%c0_175, %c0_176, %c0_177], %184 {strides = array<i32>} : memref<1x16x256xf32, #tpu.memory_space<vmem>>, vector<1x16x256xf32>,
    return
  }
  func.func @transform_0(%arg0: i32) -> (i32, i32, i32) {
    %c0_i32 = arith.constant 0 : i32
    %c0_i32_0 = arith.constant 0 : i32
    %c0_i32_1 = arith.constant 0 : i32
    return %arg0, %c0_i32, %c0_i32_0 : i32, i32, i32
  }
  func.func @transform_1(%arg0: i32) -> (i32, i32) {
    %c0_i32 = arith.constant 0 : i32
    %c0_i32_0 = arith.constant 0 : i32
    %c0_i32_1 = arith.constant 0 : i32
    return %c0_i32, %c0_i32_0 : i32, i32
  }
  func.func @transform_2(%arg0: i32) -> (i32, i32) {
    %c0_i32 = arith.constant 0 : i32
    %c0_i32_0 = arith.constant 0 : i32
    %c0_i32_1 = arith.constant 0 : i32
    return %c0_i32, %c0_i32_0 : i32, i32
  }
  func.func @transform_3(%arg0: i32) -> (i32, i32, i32) {
    %c0_i32 = arith.constant 0 : i32
    %c0_i32_0 = arith.constant 0 : i32
    %c0_i32_1 = arith.constant 0 : i32
    %c0_i32_2 = arith.constant 0 : i32
    return %c0_i32, %c0_i32_0, %c0_i32_1 : i32, i32, i32
  }
  func.func @transform_4(%arg0: i32) -> (i32, i32) {
    %c0_i32 = arith.constant 0 : i32
    %c0_i32_0 = arith.constant 0 : i32
    %c0_i32_1 = arith.constant 0 : i32
    return %c0_i32, %c0_i32_0 : i32, i32
  }
  func.func @transform_5(%arg0: i32) -> (i32, i32, i32) {
    %c0_i32 = arith.constant 0 : i32
    %c0_i32_0 = arith.constant 0 : i32
    %c0_i32_1 = arith.constant 0 : i32
    %c0_i32_2 = arith.constant 0 : i32
    return %c0_i32, %c0_i32_0, %c0_i32_1 : i32, i32, i32
  }
  func.func @transform_6(%arg0: i32) -> (i32, i32) {
    %c0_i32 = arith.constant 0 : i32
    %c0_i32_0 = arith.constant 0 : i32
    %c0_i32_1 = arith.constant 0 : i32
    return %c0_i32, %c0_i32_0 : i32, i32
  }
  func.func @transform_7(%arg0: i32) -> (i32, i32, i32) {
    %c0_i32 = arith.constant 0 : i32
    %c0_i32_0 = arith.constant 0 : i32
    %c0_i32_1 = arith.constant 0 : i32
    %c0_i32_2 = arith.constant 0 : i32
    return %c0_i32, %c0_i32_0, %c0_i32_1 : i32, i32, i32
  }
  func.func @transform_8(%arg0: i32) -> (i32, i32) {
    %c0_i32 = arith.constant 0 : i32
    %c0_i32_0 = arith.constant 0 : i32
    %c0_i32_1 = arith.constant 0 : i32
    return %c0_i32, %c0_i32_0 : i32, i32
  }
  func.func @transform_9(%arg0: i32) -> (i32, i32, i32) {
    %c0_i32 = arith.constant 0 : i32
    %c0_i32_0 = arith.constant 0 : i32
    %c0_i32_1 = arith.constant 0 : i32
    return %arg0, %c0_i32, %c0_i32_0 : i32, i32, i32
  }
}

</mosaic_0001>

<bundles_post_ra>
// kernel: tpu_custom_call.1
= control target key start
LH: loop header
LB: loop body
LE: loop exit
PB: predicated region body
PF: predicated region fallthrough
CT: control target
= control target key end

     0   :  { %s3638_s0 = inlined_call_operand.hbm [shape: bf16[2,4,512], index: 0, kind: input, shape index: {}]   ;;  %s3639_s1 = inlined_call_operand.hbm [shape: f32[1,256], index: 1, kind: input, shape index: {}]   ;;  %s3640_s2 = inlined_call_operand.vmem [shape: f32[1,256], index: 2, kind: input, shape index: {}]   ;;  %s3641_s3 = inlined_call_operand.vmem [shape: bf16[9,16,4], index: 3, kind: input, shape index: {}]   ;;  %s3642_s4 = inlined_call_operand.vmem [shape: f32[16,1], index: 4, kind: input, shape index: {}]   ;;  %s3643_s5 = inlined_call_operand.vmem [shape: bf16[9,16,16], index: 5, kind: input, shape index: {}]   ;;  %s3644_s6 = inlined_call_operand.vmem [shape: f32[16,1], index: 6, kind: input, shape index: {}]   ;;  %s3645_s7 = inlined_call_operand.vmem [shape: bf16[9,16,16], index: 7, kind: input, shape index: {}]   ;;  %s3646_s8 = inlined_call_operand.vmem [shape: f32[16,1], index: 8, kind: input, shape index: {}]   ;;  %s3647_s9 = inlined_call_operand.hbm [shape: f32[2,16,256], index: 9, kind: output, shape index: {}]  }
   0x1   :  { %3655 = sst [smem:[#allocation12_spill]] %s3639_s1 }
   0x2   :  { %14 = vsyncpa [#allocation4], 0 }
   0x3   :  { %16 = vsyncpa [#allocation4 + $0x1], 0 }
   0x4   :  { %17 = vsyncpa [#allocation7], 0 }
   0x5   :  { %18 = vsyncpa [#allocation5], 0 }
   0x6   :  { %20 = vsyncpa [#allocation5 + $0x1], 0  ;;  %s3058_s30 = smov 0   ;;  %s3060_s10 = smov 0  }
   0x7   :  { %s3062_s11 = smov 0   ;;  %s3064_s12 = smov 0  }
   0x8 LB: > { %s3079_s13 = sadd.s32 4294967295, %s2992_s12   ;;  %s2558_s14 = sadd.s32 4294967294, %s2992_s12   ;;  %s2992_s12 = sphi %s3064_s12, %s3679_s12   ;;  %s2988_s11 = sphi %s3062_s11, %s3678_s11   ;;  %s2984_s10 = sphi %s3060_s10, %s3677_s10   ;;  %s2980_s30 = sphi %s3058_s30, %s3676_s30  }
   0x9   : > { %p46_p0 = scmp.ne.s32.totalorder %s2984_s10, %s2980_s30  ;;  %p3648_p1 = scmp.eq.s32.totalorder %s3079_s13, 0 }
   0xa   : > { %p244_p3 = scmp.eq.s32.totalorder %s2558_s14, 1  ;;  %p2559_p5 = scmp.ge.s32.totalorder %s2992_s12, 1 }
   0xb   : > { %p3088_p4 = por %p3648_p1, %p46_p0  ;;  %p251_p7 = scmp.lt.s32.totalorder %s2992_s12, 3 }
   0xc   : > { %p3093_p6 = por %p244_p3, %p46_p0  ;;  %s2994_s18 = smov [#allocation6]  }
   0xd   : > { %s3656_s15 = scalar_select %p3088_p4, 1, 0 }
   0xe   : > { %s3657_s16 = scalar_select %p3093_p6, 1, 0 }
   0xf   : > { %p3098_p8 = pnand %p2559_p5, %p251_p7  ;;  %s264_s19 = sshll.u32 %s2994_s18, 4  ;;  %s265_s19 = int_to_ptr.vmem [resolvable:$true] %s264_s19 }
  0x10   : > { %s3106_s20 = sadd.s32 1, %s2992_s12   ;;  %s33_s24 = sadd.s32 1, %s2988_s11 }
  0x11   : > { %s3658_s17 = scalar_select %p3098_p8, 1, 0 }
  0x12   : > { %p2768_p10 = pneg %p3098_p8  ;;  %s30_s22 = ssub.s32 %s2992_s12, %s3106_s20 }
  0x13   : > { %p3116_p12 = scmp.eq.s32.totalorder %s30_s22, 0  ;;  %s3661_s1 = sld [smem:[#allocation12_spill]] }
  0x14   : > { %p3110_p11 = pnand %p2768_p10, %p3648_p1 }
  0x15   : > { %s3660_s23 = scalar_select %p3116_p12, 1, 0 }
  0x16   : > { %p2866_p3 = pneg %p3110_p11 }
  0x19   : > { %s2864_s27 = scalar_lea.hbm %s3661_s1, 32 }
  0x1a   : > { %p2865_p0 = scmp.ne.s32.totalorder %s3661_s1, %s2864_s27  ;;  %p2871_p10 = scmp.lt.u32.totalorder %s2864_s27, %s3661_s1 }
  0x1c   : > { %p2867_p5 = pnand %p2866_p3, %p2865_p0 }
  0x1e   : > { %p2868_p7 = pneg %p2867_p5 }
  0x20   : > { %p2873_p9 = pnand %p2871_p10, %p2868_p7 }
  0x22   : > { %2876 = shalt.err (!%p2873_p9)
}
  0x23   : > { %s2877_s22 = scalar_lea.vmem %s265_s19, 32  ;;  %p2885_p6 = scmp.lt.s32.totalorder %s265_s19, %s265_s19 }
  0x24   : > { %p2878_p1 = scmp.ne.s32.totalorder %s265_s19, %s2877_s22  ;;  %p2886_p4 = scmp.lt.s32.totalorder %s2877_s22, %s2877_s22 }
  0x26   : > { %p2880_p2 = pnand %p2878_p1, %p2866_p3  ;;  %p2887_p8 = por %p2886_p4, %p2885_p6 }
  0x28   : > { %p2881_p13 = pneg %p2880_p2 }
  0x2a   : > { %p2888_p12 = pnand %p2887_p8, %p2881_p13 }
  0x2c   : > { %2891 = shalt.err (!%p2888_p12)
}
  0x2d   : > { %2771 = dma.hbm_to_vmem [thread:$0]  (!%p3110_p11), %s3661_s1, 32, %s265_s19, [#allocation7]  }
  0x2e   : > { %p3662_p1 = scmp.ne.s32.totalorder %s3660_s23, 0  ;;  %p41_p2 = scmp.eq.s32.totalorder %s2992_s12, 0 }
  0x2f   : > { %p3663_p4 = scmp.ne.s32.totalorder %s2988_s11, %s2984_s10  ;;  %p3664_p6 = scmp.eq.s32.totalorder %s3079_s13, 1 }
  0x30   : > { %s3142_s27 = scalar_select %p3662_p1, %s2988_s11, %s33_s24  }
  0x31   : > { %p3150_p8 = por %p3664_p6, %p3663_p4  ;;  %p2781_p9 = scmp.lt.s32.totalorder %s2992_s12, 2 }
  0x32   : > { %s296_s28 = sand.u32 1, %s2988_s11   ;;  %p3666_p12 = pmov %p3663_p4 }
  0x33   : > { %s2562_s29 = sshll.u32 %s296_s28, 3  ;;  %s2686_s14 = sshll.u32 %s2992_s12, 7 }
  0x34   : > { %p42_p13 = por %p41_p2, %p3666_p12  ;;  %s3163_s19 = scalar_lea.hbm %s3638_s0, %s2686_s14 }
  0x35   : > { %s300_s23 = scalar_lea.vmem [#allocation3], %s2562_s29  ;;  %s297_s26 = scalar_lea.sflag [#allocation4], %s296_s28 }
  0x36   : > { %s308_s24 = sshll.u32 %s300_s23, 4  ;;  %p3165_p11 = pnand %p2781_p9, %p42_p13  ;;  %s3169_s24 = int_to_ptr.vmem [resolvable:$true] %s308_s24 }
  0x37   : > { %s2892_s1 = scalar_lea.hbm %s3163_s19, 128  ;;  %s2897_s18 = scalar_lea.hbm %s3638_s0, 256 }
  0x38   : > { %p2893_p0 = scmp.ne.s32.totalorder %s3163_s19, %s2892_s1  ;;  %p2894_p3 = pneg %p3165_p11 }
  0x39   : > { %p2898_p10 = scmp.lt.u32.totalorder %s3163_s19, %s3638_s0  ;;  %p2899_p1 = scmp.lt.u32.totalorder %s2897_s18, %s2892_s1 }
  0x3a   : > { %p2895_p5 = pnand %p2894_p3, %p2893_p0  ;;  %p2901_p4 = scmp.lt.u32.totalorder %s2892_s1, %s3163_s19 }
  0x3b   : > { %p2900_p2 = por %p2899_p1, %p2898_p10 }
  0x3c   : > { %p2896_p7 = pneg %p2895_p5 }
  0x3d   : > { %p2902_p6 = por %p2901_p4, %p2900_p2 }
  0x3f   : > { %p2903_p9 = pnand %p2902_p6, %p2896_p7 }
  0x41   : > { %2906 = shalt.err (!%p2903_p9)
}
  0x42   : > { %s2907_s28 = scalar_lea.vmem %s3169_s24, 128  ;;  %s2995_s14 = smov [#allocation3]  }
  0x43   : > { %p2908_p12 = scmp.ne.s32.totalorder %s3169_s24, %s2907_s28  ;;  %s2912_s29 = sshll.u32 %s2995_s14, 4  ;;  %s2913_s29 = int_to_ptr.vmem [resolvable:$false] %s2912_s29 }
  0x44   : > { %s2914_s22 = scalar_lea.vmem %s2913_s29, 256  ;;  %p2915_p5 = scmp.lt.s32.totalorder %s3169_s24, %s2913_s29 }
  0x45   : > { %p2910_p13 = pnand %p2908_p12, %p2894_p3  ;;  %p2916_p10 = scmp.lt.s32.totalorder %s2914_s22, %s2907_s28 }
  0x47   : > { %p2911_p0 = pneg %p2910_p13  ;;  %p2917_p1 = por %p2916_p10, %p2915_p5 }
  0x49   : > { %p2918_p2 = pnand %p2917_p1, %p2911_p0 }
  0x4b   : > { %2921 = shalt.err (!%p2918_p2)
}
  0x4c   : > { %2775 = dma.hbm_to_vmem [thread:$0]  (!%p3165_p11), %s3163_s19, 128, %s3169_s24, %s297_s26  }
  0x4d   : > { %p3668_p7 = scmp.ne.s32.totalorder %s3658_s17, 0 }
  0x4e   : > { %s3199_s1 = sand.u32 (!%p3668_p7), 1, %s2984_s10   ;;  %p3669_p3 = scmp.ne.s32.totalorder (!%p3668_p7), %s3656_s15, 0 }
  0x4f   : > { %317 = sbr.rel (%p3668_p7) target bundleno = 1287 (0x507), region = 56  ;;  %s2566_s18 = sshll.u32 (!%p3668_p7), %s3199_s1, 3 }
  0x50   : > { %s320_s23 = scalar_lea.sflag (!%p3668_p7), [#allocation4], %s3199_s1  ;;  %s3203_s28 = scalar_lea.vmem (!%p3668_p7), [#allocation3], %s2566_s18 }
  0x56   : > { %2967 = dma.done.wait (%p3669_p3), %s320_s23, 128  }
  0x57   : > { %2969 = vsyncadd (%p3669_p3), %s320_s23, 4294967168  ;;  %p3670_p11 = scmp.eq.s32.totalorder %s3079_s13, 0 }
  0x59   : > { %2971 = dma.done.wait (%p3670_p11), [#allocation7], 32   ;;  %p3671_p4 = pmov %p3670_p11 }
  0x5a   : > { %v453_v0 = vlaneseq  ;;  %v2996_v1 = vmov 1983009808   ;;  %v2997_v6 = vmov 0   ;;  %v370_v7 = vld [vmem:[%s3203_s28] sm:$0x3f]  ;;  %s2998_s15 = smov 16  }
  0x5b   : > { %2973 = vsyncadd (%p3671_p4), [#allocation7], 4294967264  ;;  %v451_v2 = vunpack.c.l.s4 %v2996_v1  ;;  %515 = vmatprep.mubr.bf16.mxu0 %v2997_v6  ;;  %432 = vmatprep.mubr.bf16.mxu1 %v2997_v6  ;;  %v449_v9 = vcombine.high %v370_v7, %v370_v7  ;;  %v529_v10 = vld [vmem:[%s3203_s28 + $0x2] sm:$0x3f]  ;;  %vm393_vm0 = vcmask 1041408   ;;  %s2999_s24 = smov 112  }
  0x5c   : > { %v3213_v3 = vshrl.u32 %v453_v0, 7  ;;  %2828 = vset.pattern.permute.xlu0 %v2997_v6  ;;  %2829 = vset.pattern.permute.xlu1 %v2997_v6  ;;  %v2574_v11 = vld.sshfl [vmem:[%s3203_s28 + $0x2] sm:$0x33 pattern:$0x76325410]  ;;  %v536_v16 = vcombine.high %v529_v10, %v529_v10  ;;  %vm389_vm1 = vcmask 31744  }
  0x5d   : > { %v452_v4 = vunpack.c.0.s8 %v451_v2  ;;  %v619_v14 = vld [vmem:[%s3203_s28] sm:$0x3f]  ;;  %v388_v17 = vcombine.high %v2574_v11, %v2574_v11  ;;  %v395_v18 = vsel %vm393_vm0, %v2574_v11, 0  ;;  %s3000_s25 = smov 1   ;;  %s3001_s26 = smov 127   ;;  %vm471_vm2 = vcmask 130048  }
  0x5e   : > { %v2838_v20 = vld [vmem:[%s3641_s3 + $0x20] sm:$0xff]   ;;  %v629_v24 = vcombine.high %v619_v14, %v619_v14  ;;  %s3002_s14 = smov 17   ;;  %s3003_s29 = smov 15   ;;  %v1167_v47 = vld [vmem:[%s3642_s4 + $0x8] sm:$0xff]  ;;  %vm558_vm3 = vcmask 916480   ;;  %vm651_vm4 = vcmask 7168  }
  0x5f   : > { %v3216_v5 = vsub.s32 %v452_v4, %v3213_v3  ;;  %2575 = vmatprep.subr.msk.bf16.mxu1 %vm393_vm0, %v388_v17  ;;  %v870_v22 = vld [vmem:[%s3203_s28 + $0x2] sm:$0x3f]  ;;  %s3653_s22 = smov 113   ;;  %s3651_s18 = smov 111   ;;  %vm899_vm5 = vcmask 1039360   ;;  %vm717_vm6 = vcmask 138240  }
  0x60   : > { %401 = vmatpush1.bf16.msra.mxu1 %v395_v18  ;;  %v877_v28 = vcombine.high %v870_v22, %v870_v22  ;;  %v866_v31 = vld [vmem:[%s3203_s28] sm:$0x3f]  ;;  %vm982_vm7 = vcmask 121856   ;;  %vm804_vm8 = vcmask 924672   ;;  %vm1069_vm9 = vcmask 908288  }
  0x61   : > { %v456_v8 = vrot.slane %v370_v7, %v3216_v5  ;;  %v463_v13 = vrot.slane %v449_v9, %v3216_v5  ;;  %v543_v15 = vrot.slane %v529_v10, %v3216_v5  ;;  %v636_v19 = vrot.slane %v619_v14, %v3216_v5  ;;  %v775_v34 = vld [vmem:[%s3203_s28 + $0x2] sm:$0x3f]  ;;  %v2840_v7 = vld [vmem:[%s3641_s3 + $0x38] sm:$0xff]  }
  0x62   : > { %v550_v21 = vrot.slane %v536_v16, %v3216_v5  ;;  %v643_v26 = vrot.slane %v629_v24, %v3216_v5  ;;  %v884_v27 = vrot.slane %v870_v22, %v3216_v5  ;;  %v891_v30 = vrot.slane %v877_v28, %v3216_v5  ;;  %v1040_v39 = vld [vmem:[%s3203_s28 + $0x2] sm:$0x3f] }
  0x63   : > { %465 = vrot.lane.b32.xlu0 %v456_v8, %s2998_s15  ;;  %v464_v12 = vcombine.high %v456_v8, %v456_v8  ;;  %469 = vrot.lane.b32.xlu1 %v463_v13, %s2998_s15  ;;  %v551_v23 = vcombine.high %v543_v15, %v543_v15  ;;  %v644_v25 = vcombine.high %v636_v19, %v636_v19  ;;  %v1166_v46 = vld [vmem:[%s3642_s4] sm:$0xff]  ;;  %v2837_v55 = vld [vmem:[%s3641_s3 + $0x8] sm:$0xff]  }
  0x64   : > { %2576 = vmatmul.mubr.msk.bf16.vlgmr.msra.gmra.mrb[0].mxu1 %vm389_vm1, %v2838_v20  ;;  %v892_v29 = vcombine.high %v884_v27, %v884_v27  ;;  %v967_v32 = vrot.slane %v866_v31, %v3216_v5  ;;  %v960_v33 = vcombine.high %v866_v31, %v866_v31  ;;  %v789_v37 = vrot.slane %v775_v34, %v3216_v5 }
  0x65   : > { %695 = vmatprep.mubr.bf16.mxu1 %v2997_v6  ;;  %v782_v38 = vcombine.high %v775_v34, %v775_v34  ;;  %v1054_v42 = vrot.slane %v1040_v39, %v3216_v5  ;;  %v1047_v43 = vcombine.high %v1040_v39, %v1040_v39 }
  0x66   : > { %v975_v35 = vcombine.high %v967_v32, %v967_v32  ;;  %v974_v36 = vrot.slane %v960_v33, %v3216_v5  ;;  %v797_v40 = vcombine.high %v789_v37, %v789_v37 }
  0x67   : > { %467 = vrot.lane.b32.xlu0 %v464_v12, %s2998_s15  ;;  %552 = vrot.lane.b32.xlu1 %v543_v15, %s2999_s24  ;;  %v796_v41 = vrot.slane %v782_v38, %v3216_v5  ;;  %v1062_v44 = vcombine.high %v1054_v42, %v1054_v42  ;;  %v1061_v45 = vrot.slane %v1047_v43, %v3216_v5  ;;  %v2839_v5 = vld [vmem:[%s3641_s3 + $0x18] sm:$0xff]   ;;  %v2841_v15 = vld [vmem:[%s3641_s3 + $0x28] sm:$0xff]  }
  0x6b   : > { %645 = vrot.lane.b32.xlu0 %v636_v19, %s3000_s25  ;;  %556 = vrot.lane.b32.xlu1 %v550_v21, %s2999_s24  ;;  %v2842_v21 = vld [vmem:[%s3641_s3] sm:$0xff]  }
  0x6f   : > { %554 = vrot.lane.b32.xlu0 %v551_v23, %s2999_s24  ;;  %647 = vrot.lane.b32.xlu1 %v644_v25, %s3000_s25 }
  0x73   : > { %649 = vrot.lane.b32.xlu0 %v643_v26, %s3000_s25  ;;  %893 = vrot.lane.b32.xlu1 %v884_v27, %s3001_s26 }
  0x77   : > { %895 = vrot.lane.b32.xlu0 %v892_v29, %s3001_s26  ;;  %897 = vrot.lane.b32.xlu1 %v891_v30, %s3001_s26  ;;  %v2843_v29 = vld [vmem:[%s3641_s3 + $0x10] sm:$0xff]  }
  0x7b   : > { %711 = vrot.lane.b32.xlu0 %v636_v19, %s3002_s14  ;;  %713 = vrot.lane.b32.xlu1 %v644_v25, %s3002_s14 }
  0x7f   : > { %715 = vrot.lane.b32.xlu0 %v643_v26, %s3002_s14  ;;  %976 = vrot.lane.b32.xlu1 %v967_v32, %s3003_s29 }
  0x83   : > { %978 = vrot.lane.b32.xlu0 %v975_v35, %s3003_s29  ;;  %980 = vrot.lane.b32.xlu1 %v974_v36, %s3003_s29  ;;  %v2844_v35 = vld [vmem:[%s3641_s3 + $0x30] sm:$0xff]  }
  0x87   : > { %798 = vrot.lane.b32.xlu0 %v789_v37, %s3653_s22  ;;  %800 = vrot.lane.b32.xlu1 %v797_v40, %s3653_s22 }
  0x8b   : > { %802 = vrot.lane.b32.xlu0 %v796_v41, %s3653_s22  ;;  %1063 = vrot.lane.b32.xlu1 %v1054_v42, %s3651_s18  ;;  %v2845_v41 = vld [vmem:[%s3641_s3 + $0x40] sm:$0xff]  }
  0x8f   : > { %1065 = vrot.lane.b32.xlu0 %v1062_v44, %s3651_s18  ;;  %1067 = vrot.lane.b32.xlu1 %v1061_v45, %s3651_s18 }
  0x93   : > { %1170 = vperm.xlu0 %2828, %v1166_v46   ;;  %1175 = vperm.xlu1 %2829, %v1167_v47  }
  0xd5   : > { %v466_v48 = vpop.permute.xlu0 %465  ;;  %v470_v49 = vpop.permute.xlu1 %469 }
  0xd9   : > { %v468_v50 = vpop.permute.xlu0 %467  ;;  %v553_v53 = vpop.permute.xlu1 %552 }
  0xda   : > { %v473_v51 = vsel %vm471_vm2, %v468_v50, %v470_v49  ;;  %v472_v52 = vsel %vm471_vm2, %v466_v48, %v468_v50 }
  0xdb   : > { %2578 = vmatprep.subr.msk.bf16.mxu0 %vm393_vm0, %v473_v51  ;;  %v478_v54 = vsel %vm393_vm0, %v472_v52, 0 }
  0xdc   : > { %484 = vmatpush1.bf16.msra.mxu0 %v478_v54  ;;  %v1131_v54 = vsub.s32 0, %v3213_v3 }
  0xdd   : > { %v646_v56 = vpop.permute.xlu0 %645  ;;  %v557_v57 = vpop.permute.xlu1 %556 }
  0xdf   : > { %2579 = vmatmul.mubr.msk.bf16.vlgmr.msra.gmra.mrb[0].mxu0 %vm389_vm1, %v2837_v55  ;;  %v365_v55 = vld [vmem:[#allocation6] sm:$0x3] }
  0xe0   : > { %602 = vmatprep.mubr.bf16.mxu0 %v2997_v6 }
  0xe1   : > { %v555_v58 = vpop.permute.xlu0 %554  ;;  %v648_v62 = vpop.permute.xlu1 %647 }
  0xe2   : > { %v559_v59 = vsel %vm558_vm3, %v553_v53, %v555_v58  ;;  %v560_v60 = vsel %vm558_vm3, %v555_v58, %v557_v57  ;;  %v652_v63 = vsel %vm651_vm4, %v646_v56, %v648_v62  ;;  %v1135_v56 = vsub.s32 1, %v3213_v3 }
  0xe3   : > { %v565_v61 = vsel %vm393_vm0, %v559_v59, 0  ;;  %2583 = vmatprep.subr.msk.bf16.mxu0 %vm393_vm0, %v560_v60  ;;  %v658_v2 = vsel %vm393_vm0, %v652_v63, 0  ;;  %v3355_v57 = vrot.slane %v365_v55, %v1131_v54 }
  0xe4   : > { %571 = vmatpush1.bf16.msra.mxu0 %v565_v61  ;;  %v3357_v58 = vrot.slane %v365_v55, %v1135_v56 }
  0xe5   : > { %v650_v0 = vpop.permute.xlu0 %649  ;;  %v894_v4 = vpop.permute.xlu1 %893 }
  0xe6   : > { %v653_v1 = vsel %vm651_vm4, %v648_v62, %v650_v0  ;;  %v366_v0 = vld [vmem:[%s3640_s2] sm:$0x3] }
  0xe7   : > { %2588 = vmatprep.subr.msk.bf16.mxu1 %vm393_vm0, %v653_v1 }
  0xe8   : > { %664 = vmatpush1.bf16.msra.mxu1 %v658_v2 }
  0xe9   : > { %v896_v8 = vpop.permute.xlu0 %895  ;;  %v898_v10 = vpop.permute.xlu1 %897 }
  0xea   : > { %v900_v9 = vsel %vm899_vm5, %v894_v4, %v896_v8  ;;  %v901_v11 = vsel %vm899_vm5, %v896_v8, %v898_v10  ;;  %v3366_v8 = vrot.slane %v366_v0, %v1131_v54  ;;  %v3368_v10 = vrot.slane %v366_v0, %v1135_v56 }
  0xeb   : > { %2589 = vmatmul.mubr.msk.bf16.vlgmr.msra.gmra.mrb[4].mxu1 %vm389_vm1, %v2839_v5  ;;  %2584 = vmatmul.mubr.msk.bf16.vlgmr.msra.gmra.mrb[0].mxu0 %vm389_vm1, %v2840_v7  ;;  %v906_v12 = vsel %vm393_vm0, %v900_v9, 0 }
  0xec   : > { %943 = vmatprep.mubr.bf16.mxu0 %v2997_v6  ;;  %761 = vmatprep.mubr.bf16.mxu1 %v2997_v6 }
  0xed   : > { %v712_v13 = vpop.permute.xlu0 %711  ;;  %2603 = vmatprep.subr.msk.bf16.mxu0 %vm393_vm0, %v901_v11  ;;  %v714_v14 = vpop.permute.xlu1 %713 }
  0xee   : > { %912 = vmatpush1.bf16.msra.mxu0 %v906_v12  ;;  %v718_v16 = vsel %vm717_vm6, %v712_v13, %v714_v14 }
  0xef   : > { %v724_v17 = vsel %vm393_vm0, %v718_v16, 0 }
  0xf1   : > { %v716_v18 = vpop.permute.xlu0 %715  ;;  %v977_v20 = vpop.permute.xlu1 %976 }
  0xf2   : > { %v719_v19 = vsel %vm717_vm6, %v714_v14, %v716_v18 }
  0xf3   : > { %2591 = vmatprep.subr.msk.bf16.mxu1 %vm393_vm0, %v719_v19  ;;  %2604 = vmatmul.mubr.msk.bf16.vlgmr.msra.gmra.mrb[4].mxu0 %vm389_vm1, %v2841_v15 }
  0xf4   : > { %730 = vmatpush1.bf16.msra.mxu1 %v724_v17  ;;  %1026 = vmatprep.mubr.bf16.mxu0 %v2997_v6 }
  0xf5   : > { %v979_v22 = vpop.permute.xlu0 %978  ;;  %v981_v24 = vpop.permute.xlu1 %980 }
  0xf6   : > { %v983_v23 = vsel %vm982_vm7, %v977_v20, %v979_v22  ;;  %v984_v25 = vsel %vm982_vm7, %v979_v22, %v981_v24 }
  0xf7   : > { %2592 = vmatmul.mubr.msk.bf16.vlgmr.msra.gmra.mrb[4].mxu1 %vm389_vm1, %v2842_v21  ;;  %v989_v26 = vsel %vm393_vm0, %v983_v23, 0  ;;  %2606 = vmatprep.subr.msk.bf16.mxu0 %vm393_vm0, %v984_v25 }
  0xf8   : > { %848 = vmatprep.mubr.bf16.mxu1 %v2997_v6  ;;  %995 = vmatpush1.bf16.msra.mxu0 %v989_v26 }
  0xf9   : > { %v799_v27 = vpop.permute.xlu0 %798  ;;  %v801_v28 = vpop.permute.xlu1 %800 }
  0xfa   : > { %v805_v30 = vsel %vm804_vm8, %v799_v27, %v801_v28 }
  0xfb   : > { %v811_v31 = vsel %vm393_vm0, %v805_v30, 0 }
  0xfd   : > { %v803_v32 = vpop.permute.xlu0 %802  ;;  %v1064_v34 = vpop.permute.xlu1 %1063 }
  0xfe   : > { %v806_v33 = vsel %vm804_vm8, %v801_v28, %v803_v32 }
  0xff   : > { %2596 = vmatprep.subr.msk.bf16.mxu1 %vm393_vm0, %v806_v33  ;;  %2607 = vmatmul.mubr.msk.bf16.vlgmr.msra.gmra.mrb[4].mxu0 %vm389_vm1, %v2843_v29 }
 0x100   : > { %817 = vmatpush1.bf16.msra.mxu1 %v811_v31  ;;  %1113 = vmatprep.mubr.bf16.mxu0 %v2997_v6 }
 0x101   : > { %v1066_v36 = vpop.permute.xlu0 %1065  ;;  %v1068_v38 = vpop.permute.xlu1 %1067 }
 0x102   : > { %v1070_v37 = vsel %vm1069_vm9, %v1064_v34, %v1066_v36  ;;  %v1071_v39 = vsel %vm1069_vm9, %v1066_v36, %v1068_v38 }
 0x103   : > { %2597 = vmatmul.mubr.msk.bf16.vlgmr.msra.gmra.mrb[4].mxu1 %vm389_vm1, %v2844_v35  ;;  %v1076_v40 = vsel %vm393_vm0, %v1070_v37, 0  ;;  %2611 = vmatprep.subr.msk.bf16.mxu0 %vm393_vm0, %v1071_v39  ;;  %v2846_v39 = vld [vmem:[%s3643_s5 + $0x20] sm:$0xff]  }
 0x104   : > { %1248 = vmatprep.mubr.bf16.mxu1 %v2997_v6  ;;  %1082 = vmatpush1.bf16.msra.mxu0 %v1076_v40  ;;  %v1804_v40 = vld [vmem:[%s3644_s6] sm:$0xff] }
 0x10b   : > { %2612 = vmatmul.mubr.msk.bf16.vlgmr.msra.gmra.mrb[4].mxu0 %vm389_vm1, %v2845_v41  ;;  %v1805_v41 = vld [vmem:[%s3644_s6 + $0x8] sm:$0xff] }
 0x10c   : > { %1452 = vmatprep.mubr.bf16.mxu0 %v2997_v6 }
 0x112   : > { %v1171_v16 = vpop.permute.xlu0 %1170  ;;  %v1176_v22 = vpop.permute.xlu1 %1175 }
 0x137   : > { %v434_v42 = vpop.f32.mrb[0].mxu1 }
 0x138   : > { %v436_v43 = vpop.f32.mrb[1].mxu1 }
 0x139   : > { %v438_v44 = vpop.f32.mrb[2].mxu1 }
 0x13a   : > { %v440_v45 = vpop.f32.mrb[3].mxu1 }
 0x1be   : > { %v604_v46 = vpop.f32.mrb[0].mxu0 }
 0x1bf   : > { %v2688_v47 = vadd.f32 %v604_v46, %v434_v42  ;;  %v606_v48 = vpop.f32.mrb[1].mxu0 }
 0x1c0   : > { %v2689_v49 = vadd.f32 %v606_v48, %v436_v43  ;;  %v608_v50 = vpop.f32.mrb[2].mxu0  ;;  %v2847_v48 = vld [vmem:[%s3643_s5 + $0x8] sm:$0xff]  }
 0x1c1   : > { %v2690_v51 = vadd.f32 %v608_v50, %v438_v44  ;;  %v610_v52 = vpop.f32.mrb[3].mxu0 }
 0x1c2   : > { %v2691_v53 = vadd.f32 %v610_v52, %v440_v45 }
 0x1d6   : > { %v850_v59 = vpop.f32.mrb[4].mxu1 }
 0x1d7   : > { %v1139_v60 = vmul.f32 %v3355_v57, %v850_v59  ;;  %v852_v61 = vpop.f32.mrb[5].mxu1 }
 0x1d8   : > { %v1140_v62 = vmul.f32 %v3357_v58, %v852_v61  ;;  %v854_v63 = vpop.f32.mrb[6].mxu1  ;;  %v2848_v61 = vld [vmem:[%s3643_s5 + $0x38] sm:$0xff]  }
 0x1d9   : > { %v1143_v1 = vadd.f32 %v2688_v47, %v1139_v60  ;;  %v1141_v2 = vmul.f32 %v3355_v57, %v854_v63  ;;  %v856_v4 = vpop.f32.mrb[7].mxu1 }
 0x1da   : > { %v1144_v3 = vadd.f32 %v2689_v49, %v1140_v62  ;;  %v1142_v5 = vmul.f32 %v3357_v58, %v856_v4  ;;  %v2849_v62 = vld [vmem:[%s3643_s5 + $0x18] sm:$0xff]  }
 0x1db   : > { %v1145_v7 = vadd.f32 %v2690_v51, %v1141_v2 }
 0x1dc   : > { %v1146_v9 = vadd.f32 %v2691_v53, %v1142_v5  ;;  %v2850_v5 = vld [vmem:[%s3643_s5 + $0x28] sm:$0xff]  }
 0x1de   : > { %v1115_v11 = vpop.f32.mrb[4].mxu0 }
 0x1df   : > { %v1158_v12 = vmul.f32 %v3366_v8, %v1115_v11  ;;  %v1117_v13 = vpop.f32.mrb[5].mxu0 }
 0x1e0   : > { %v1159_v14 = vmul.f32 %v3368_v10, %v1117_v13  ;;  %v1119_v15 = vpop.f32.mrb[6].mxu0  ;;  %v2851_v13 = vld [vmem:[%s3643_s5] sm:$0xff]  }
 0x1e1   : > { %v1162_v17 = vadd.f32 %v1158_v12, %v1143_v1  ;;  %v1160_v18 = vmul.f32 %v3366_v8, %v1119_v15  ;;  %v1121_v19 = vpop.f32.mrb[7].mxu0 }
 0x1e2   : > { %v1163_v20 = vadd.f32 %v1159_v14, %v1144_v3  ;;  %v1161_v21 = vmul.f32 %v3368_v10, %v1121_v19 }
 0x1e3   : > { %v1164_v23 = vadd.f32 %v1160_v18, %v1145_v7  ;;  %v1178_v24 = vadd.f32 %v1171_v16, %v1162_v17 }
 0x1e4   : > { %v1165_v25 = vadd.f32 %v1161_v21, %v1146_v9  ;;  %v1179_v26 = vadd.f32 %v1171_v16, %v1163_v20  ;;  %v2852_v20 = vld [vmem:[%s3643_s5 + $0x10] sm:$0xff]  }
 0x1e5   : > { %v1186_v27 = vmul.f32 0.01, %v1178_v24  ;;  %v1180_v28 = vadd.f32 %v1176_v22, %v1164_v23  ;;  %vm1182_vm10 = vcmp.ge.f32.partialorder %v1178_v24, 0.0 }
 0x1e6   : > { %v1187_v29 = vmul.f32 0.01, %v1179_v26  ;;  %v1181_v30 = vadd.f32 %v1176_v22, %v1165_v25  ;;  %vm1183_vm11 = vcmp.ge.f32.partialorder %v1179_v26, 0.0  ;;  %v2853_v25 = vld [vmem:[%s3643_s5 + $0x30] sm:$0xff]  }
 0x1e7   : > { %vm1184_vm12 = vcmp.ge.f32.partialorder %v1180_v28, 0.0  ;;  %v1188_v31 = vmul.f32 0.01, %v1180_v28  ;;  %v1190_v33 = vsel %vm1182_vm10, %v1178_v24, %v1186_v27 }
 0x1e8   : > { %vm1185_vm13 = vcmp.ge.f32.partialorder %v1181_v30, 0.0  ;;  %v1189_v32 = vmul.f32 0.01, %v1181_v30  ;;  %v1191_v35 = vsel %vm1183_vm11, %v1179_v26, %v1187_v29 }
 0x1e9   : > { %v1192_v34 = vsel %vm1184_vm12, %v1180_v28, %v1188_v31 }
 0x1ea   : > { %v1193_v36 = vsel %vm1185_vm13, %v1181_v30, %v1189_v32  ;;  %v1194_v37 = vpack.c.bf16 %v1192_v34, %v1190_v33  ;;  %v2854_v30 = vld [vmem:[%s3643_s5 + $0x40] sm:$0xff]  }
 0x1eb   : > { %v1195_v38 = vpack.c.bf16 %v1193_v36, %v1191_v35 }
 0x1ec   : > { %1269 = vrot.lane.b32.xlu1 %v1194_v37, %s2998_s15 }
 0x1ed   : > { %1271 = vrot.lane.b32.xlu0 %v1195_v38, %s2998_s15  ;;  %1216 = vmatprep.subr.bf16.mxu1 %v1195_v38 }
 0x1ee   : > { %1217 = vmatpush1.bf16.msra.mxu1 %v1194_v37 }
 0x1f0   : > { %1267 = vrot.lane.b32.xlu1 %v2997_v6, %s2998_s15 }
 0x1f1   : > { %1337 = vrot.lane.b32.xlu0 %v1194_v37, %s2999_s24  ;;  %2618 = vmatmul.mubr.msk.bf16.vlgmr.msra.gmra.mrb[8].mxu1 %vm471_vm2, %v2846_v39 }
 0x1f2   : > { %1312 = vmatprep.mubr.bf16.mxu1 %v2997_v6 }
 0x1f4   : > { %1341 = vrot.lane.b32.xlu1 %v2997_v6, %s2999_s24 }
 0x1f5   : > { %1339 = vrot.lane.b32.xlu0 %v1195_v38, %s2999_s24 }
 0x1f8   : > { %1409 = vrot.lane.b32.xlu1 %v1194_v37, %s3000_s25 }
 0x1f9   : > { %1411 = vrot.lane.b32.xlu0 %v1195_v38, %s3000_s25 }
 0x1fc   : > { %1407 = vrot.lane.b32.xlu1 %v2997_v6, %s3000_s25 }
 0x1fd   : > { %1605 = vrot.lane.b32.xlu0 %v1195_v38, %s3001_s26 }
 0x200   : > { %1607 = vrot.lane.b32.xlu1 %v2997_v6, %s3001_s26 }
 0x201   : > { %1603 = vrot.lane.b32.xlu0 %v1194_v37, %s3001_s26 }
 0x204   : > { %1470 = vrot.lane.b32.xlu1 %v1194_v37, %s3002_s14 }
 0x205   : > { %1666 = vrot.lane.b32.xlu0 %v1194_v37, %s3003_s29 }
 0x208   : > { %1468 = vrot.lane.b32.xlu1 %v2997_v6, %s3002_s14 }
 0x209   : > { %1472 = vrot.lane.b32.xlu0 %v1195_v38, %s3002_s14 }
 0x20c   : > { %1668 = vrot.lane.b32.xlu1 %v1195_v38, %s3003_s29 }
 0x20d   : > { %1664 = vrot.lane.b32.xlu0 %v2997_v6, %s3003_s29 }
 0x210   : > { %1532 = vrot.lane.b32.xlu1 %v1194_v37, %s3653_s22 }
 0x211   : > { %1536 = vrot.lane.b32.xlu0 %v2997_v6, %s3653_s22 }
 0x214   : > { %1534 = vrot.lane.b32.xlu1 %v1195_v38, %s3653_s22 }
 0x215   : > { %1730 = vrot.lane.b32.xlu0 %v1195_v38, %s3651_s18 }
 0x218   : > { %1732 = vrot.lane.b32.xlu1 %v2997_v6, %s3651_s18 }
 0x219   : > { %1728 = vrot.lane.b32.xlu0 %v1194_v37, %s3651_s18  ;;  %s3006_s18 = smov [#allocation8]  }
 0x21a   : > { %s2926_s23 = sshll.u32 %s3006_s18, 4  ;;  %s2927_s23 = int_to_ptr.vmem [resolvable:$false] %s2926_s23 }
 0x21b   : > { %s2928_s28 = scalar_lea.vmem %s2927_s23, 1024 }
 0x21c   : > { %1808 = vperm.xlu1 %2829, %v1804_v40  }
 0x21d   : > { %1813 = vperm.xlu0 %2828, %v1805_v41  }
 0x25e   : > { %v1270_v42 = vpop.permute.xlu1 %1269 }
 0x25f   : > { %v1272_v43 = vpop.permute.xlu0 %1271 }
 0x260   : > { %v1274_v44 = vsel %vm471_vm2, %v1270_v42, %v1272_v43 }
 0x261   : > { %1280 = vmatprep.subr.bf16.mxu1 %v1274_v44 }
 0x262   : > { %v1268_v45 = vpop.permute.xlu1 %1267 }
 0x263   : > { %v1273_v46 = vsel %vm471_vm2, %v1268_v45, %v1270_v42  ;;  %v1338_v47 = vpop.permute.xlu0 %1337 }
 0x264   : > { %1281 = vmatpush1.bf16.msra.mxu1 %v1273_v46 }
 0x266   : > { %v1342_v49 = vpop.permute.xlu1 %1341 }
 0x267   : > { %v1340_v50 = vpop.permute.xlu0 %1339  ;;  %2620 = vmatmul.mubr.msk.bf16.vlgmr.msra.gmra.mrb[8].mxu1 %vm471_vm2, %v2847_v48 }
 0x268   : > { %v1343_v51 = vsel %vm558_vm3, %v1338_v47, %v1340_v50  ;;  %v1344_v52 = vsel %vm558_vm3, %v1340_v50, %v1342_v49  ;;  %1382 = vmatprep.mubr.bf16.mxu1 %v2997_v6 }
 0x269   : > { %1350 = vmatprep.subr.bf16.mxu1 %v1344_v52 }
 0x26a   : > { %v1410_v53 = vpop.permute.xlu1 %1409  ;;  %1351 = vmatpush1.bf16.msra.mxu1 %v1343_v51 }
 0x26b   : > { %v1412_v54 = vpop.permute.xlu0 %1411 }
 0x26c   : > { %v1414_v55 = vsel %vm651_vm4, %v1410_v53, %v1412_v54 }
 0x26d   : > { %1420 = vmatprep.subr.bf16.mxu0 %v1414_v55 }
 0x26e   : > { %v1408_v56 = vpop.permute.xlu1 %1407 }
 0x26f   : > { %v1413_v59 = vsel %vm651_vm4, %v1408_v56, %v1410_v53  ;;  %v1606_v60 = vpop.permute.xlu0 %1605 }
 0x270   : > { %1421 = vmatpush1.bf16.msra.mxu0 %v1413_v59 }
 0x272   : > { %v1608_v63 = vpop.permute.xlu1 %1607 }
 0x273   : > { %v1604_v0 = vpop.permute.xlu0 %1603  ;;  %2624 = vmatmul.mubr.msk.bf16.vlgmr.msra.gmra.mrb[8].mxu1 %vm471_vm2, %v2848_v61  ;;  %v1610_v1 = vsel %vm899_vm5, %v1606_v60, %v1608_v63  ;;  %2628 = vmatmul.mubr.msk.bf16.vlgmr.msra.gmra.mrb[8].mxu0 %vm471_vm2, %v2849_v62 }
 0x274   : > { %v1609_v2 = vsel %vm899_vm5, %v1604_v0, %v1606_v60  ;;  %1616 = vmatprep.subr.bf16.mxu1 %v1610_v1  ;;  %1648 = vmatprep.mubr.bf16.mxu1 %v2997_v6 }
 0x275   : > { %1617 = vmatpush1.bf16.msra.mxu1 %v1609_v2  ;;  %1513 = vmatprep.mubr.bf16.mxu0 %v2997_v6 }
 0x276   : > { %v1471_v4 = vpop.permute.xlu1 %1470 }
 0x277   : > { %v1667_v3 = vpop.permute.xlu0 %1666 }
 0x27a   : > { %v1469_v7 = vpop.permute.xlu1 %1468 }
 0x27b   : > { %v1473_v9 = vpop.permute.xlu0 %1472  ;;  %2640 = vmatmul.mubr.msk.bf16.vlgmr.msra.gmra.mrb[12].mxu1 %vm471_vm2, %v2850_v5  ;;  %v1474_v12 = vsel %vm717_vm6, %v1469_v7, %v1471_v4 }
 0x27c   : > { %v1475_v11 = vsel %vm717_vm6, %v1471_v4, %v1473_v9  ;;  %1709 = vmatprep.mubr.bf16.mxu1 %v2997_v6 }
 0x27d   : > { %1481 = vmatprep.subr.bf16.mxu0 %v1475_v11 }
 0x27e   : > { %1482 = vmatpush1.bf16.msra.mxu0 %v1474_v12  ;;  %v1669_v14 = vpop.permute.xlu1 %1668 }
 0x27f   : > { %v1665_v15 = vpop.permute.xlu0 %1664  ;;  %v1671_v16 = vsel %vm982_vm7, %v1667_v3, %v1669_v14 }
 0x280   : > { %v1670_v17 = vsel %vm982_vm7, %v1665_v15, %v1667_v3  ;;  %1677 = vmatprep.subr.bf16.mxu1 %v1671_v16  ;;  %v2855_v16 = vld [vmem:[%s3645_s7 + $0x20] sm:$0xff]  }
 0x281   : > { %2630 = vmatmul.mubr.msk.bf16.vlgmr.msra.gmra.mrb[8].mxu0 %vm471_vm2, %v2851_v13  ;;  %1678 = vmatpush1.bf16.msra.mxu1 %v1670_v17  ;;  %v2441_v17 = vld [vmem:[%s3646_s8] sm:$0xff] }
 0x282   : > { %v1533_v18 = vpop.permute.xlu1 %1532  ;;  %1577 = vmatprep.mubr.bf16.mxu0 %v2997_v6 }
 0x283   : > { %v1537_v19 = vpop.permute.xlu0 %1536 }
 0x286   : > { %v1535_v21 = vpop.permute.xlu1 %1534 }
 0x287   : > { %v1538_v22 = vsel %vm804_vm8, %v1533_v18, %v1535_v21  ;;  %v1731_v23 = vpop.permute.xlu0 %1730  ;;  %2642 = vmatmul.mubr.msk.bf16.vlgmr.msra.gmra.mrb[12].mxu1 %vm471_vm2, %v2852_v20  ;;  %v1539_v24 = vsel %vm804_vm8, %v1535_v21, %v1537_v19  ;;  %v2442_v18 = vld [vmem:[%s3646_s8 + $0x8] sm:$0xff] }
 0x288   : > { %1545 = vmatprep.subr.bf16.mxu0 %v1539_v24  ;;  %1773 = vmatprep.mubr.bf16.mxu1 %v2997_v6 }
 0x289   : > { %1546 = vmatpush1.bf16.msra.mxu0 %v1538_v22 }
 0x28a   : > { %v1733_v26 = vpop.permute.xlu1 %1732 }
 0x28b   : > { %v1729_v27 = vpop.permute.xlu0 %1728  ;;  %v1735_v28 = vsel %vm1069_vm9, %v1731_v23, %v1733_v26 }
 0x28c   : > { %v1734_v29 = vsel %vm1069_vm9, %v1729_v27, %v1731_v23  ;;  %1741 = vmatprep.subr.bf16.mxu1 %v1735_v28 }
 0x28d   : > { %2634 = vmatmul.mubr.msk.bf16.vlgmr.msra.gmra.mrb[8].mxu0 %vm471_vm2, %v2853_v25  ;;  %1742 = vmatpush1.bf16.msra.mxu1 %v1734_v29  ;;  %v2856_v25 = vld [vmem:[%s3645_s7 + $0x8] sm:$0xff]  }
 0x28e   : > { %1885 = vmatprep.mubr.bf16.mxu0 %v2997_v6 }
 0x293   : > { %2646 = vmatmul.mubr.msk.bf16.vlgmr.msra.gmra.mrb[12].mxu1 %vm471_vm2, %v2854_v30 }
 0x294   : > { %2089 = vmatprep.mubr.bf16.mxu1 %v2997_v6 }
 0x29b   : > { %v1809_v55 = vpop.permute.xlu1 %1808 }
 0x29c   : > { %v1814_v62 = vpop.permute.xlu0 %1813 }
 0x346   : > { %v1384_v31 = vpop.f32.mrb[8].mxu1 }
 0x347   : > { %v1386_v32 = vpop.f32.mrb[9].mxu1 }
 0x348   : > { %v1388_v33 = vpop.f32.mrb[10].mxu1 }
 0x349   : > { %v1390_v34 = vpop.f32.mrb[11].mxu1 }
 0x360   : > { %v1579_v35 = vpop.f32.mrb[8].mxu0 }
 0x361   : > { %v1788_v36 = vmul.f32 %v1579_v35, %v3355_v57  ;;  %v1581_v37 = vpop.f32.mrb[9].mxu0 }
 0x362   : > { %v1789_v38 = vmul.f32 %v1581_v37, %v3357_v58  ;;  %v1583_v39 = vpop.f32.mrb[10].mxu0  ;;  %v2858_v37 = vld [vmem:[%s3645_s7 + $0x18] sm:$0xff]  }
 0x363   : > { %v1792_v40 = vadd.f32 %v1788_v36, %v1384_v31  ;;  %v1790_v41 = vmul.f32 %v1583_v39, %v3355_v57  ;;  %v1585_v42 = vpop.f32.mrb[11].mxu0  ;;  %v2857_v36 = vld [vmem:[%s3645_s7 + $0x38] sm:$0xff]  }
 0x364   : > { %v1793_v43 = vadd.f32 %v1789_v38, %v1386_v32  ;;  %v1791_v44 = vmul.f32 %v1585_v42, %v3357_v58 }
 0x365   : > { %v1794_v45 = vadd.f32 %v1790_v41, %v1388_v33 }
 0x366   : > { %v1795_v46 = vadd.f32 %v1791_v44, %v1390_v34  ;;  %v1775_v47 = vpop.f32.mrb[12].mxu1  ;;  %v2859_v44 = vld [vmem:[%s3645_s7 + $0x28] sm:$0xff]  }
 0x367   : > { %v1796_v48 = vmul.f32 %v1775_v47, %v3366_v8  ;;  %v1777_v49 = vpop.f32.mrb[13].mxu1 }
 0x368   : > { %v1797_v50 = vmul.f32 %v1777_v49, %v3368_v10  ;;  %v1779_v51 = vpop.f32.mrb[14].mxu1  ;;  %v2860_v49 = vld [vmem:[%s3645_s7] sm:$0xff]  }
 0x369   : > { %v1800_v52 = vadd.f32 %v1796_v48, %v1792_v40  ;;  %v1798_v53 = vmul.f32 %v1779_v51, %v3366_v8  ;;  %v1781_v54 = vpop.f32.mrb[15].mxu1 }
 0x36a   : > { %v1801_v56 = vadd.f32 %v1797_v50, %v1793_v43  ;;  %v1799_v59 = vmul.f32 %v1781_v54, %v3368_v10 }
 0x36b   : > { %v1816_v60 = vadd.f32 %v1809_v55, %v1800_v52  ;;  %v1802_v61 = vadd.f32 %v1798_v53, %v1794_v45 }
 0x36c   : > { %v1817_v63 = vadd.f32 %v1809_v55, %v1801_v56  ;;  %v1803_v0 = vadd.f32 %v1799_v59, %v1795_v46  ;;  %v2861_v56 = vld [vmem:[%s3645_s7 + $0x10] sm:$0xff]  }
 0x36d   : > { %v1824_v1 = vmul.f32 0.01, %v1816_v60  ;;  %v1818_v2 = vadd.f32 %v1814_v62, %v1802_v61  ;;  %vm1820_vm14 = vcmp.ge.f32.partialorder %v1816_v60, 0.0 }
 0x36e   : > { %v1825_v4 = vmul.f32 0.01, %v1817_v63  ;;  %v1819_v3 = vadd.f32 %v1814_v62, %v1803_v0  ;;  %vm1821_vm15 = vcmp.ge.f32.partialorder %v1817_v63, 0.0 }
 0x36f   : > { %vm1822_vm0 = vcmp.ge.f32.partialorder %v1818_v2, 0.0  ;;  %v1826_v5 = vmul.f32 0.01, %v1818_v2  ;;  %v1828_v9 = vsel %vm1820_vm14, %v1816_v60, %v1824_v1 }
 0x370   : > { %vm1823_vm1 = vcmp.ge.f32.partialorder %v1819_v3, 0.0  ;;  %v1827_v7 = vmul.f32 0.01, %v1819_v3  ;;  %v1829_v12 = vsel %vm1821_vm15, %v1817_v63, %v1825_v4  ;;  %v2862_v63 = vld [vmem:[%s3645_s7 + $0x30] sm:$0xff]  }
 0x371   : > { %v1830_v11 = vsel %vm1822_vm0, %v1818_v2, %v1826_v5 }
 0x372   : > { %v1832_v13 = vpack.c.bf16 %v1830_v11, %v1828_v9  ;;  %v1831_v14 = vsel %vm1823_vm1, %v1819_v3, %v1827_v7  ;;  %v2863_v3 = vld [vmem:[%s3645_s7 + $0x40] sm:$0xff]  }
 0x373   : > { %v1833_v15 = vpack.c.bf16 %v1831_v14, %v1829_v12 }
 0x374   : > { %1906 = vrot.lane.b32.xlu1 %v1832_v13, %s2998_s15 }
 0x375   : > { %1908 = vrot.lane.b32.xlu0 %v1833_v15, %s2998_s15  ;;  %1853 = vmatprep.subr.bf16.mxu0 %v1833_v15 }
 0x376   : > { %1854 = vmatpush1.bf16.msra.mxu0 %v1832_v13 }
 0x378   : > { %1904 = vrot.lane.b32.xlu1 %v2997_v6, %s2998_s15 }
 0x379   : > { %1974 = vrot.lane.b32.xlu0 %v1832_v13, %s2999_s24  ;;  %2652 = vmatmul.mubr.msk.bf16.vlgmr.msra.gmra.mrb[12].mxu0 %vm471_vm2, %v2855_v16 }
 0x37a   : > { %1949 = vmatprep.mubr.bf16.mxu0 %v2997_v6 }
 0x37c   : > { %1978 = vrot.lane.b32.xlu1 %v2997_v6, %s2999_s24 }
 0x37d   : > { %1976 = vrot.lane.b32.xlu0 %v1833_v15, %s2999_s24  ;;  %s3672_s24 = smov 113  }
 0x380   : > { %2046 = vrot.lane.b32.xlu1 %v1832_v13, %s3000_s25 }
 0x381   : > { %2048 = vrot.lane.b32.xlu0 %v1833_v15, %s3000_s25 }
 0x384   : > { %2044 = vrot.lane.b32.xlu1 %v2997_v6, %s3000_s25  ;;  %s3673_s25 = smov 111  }
 0x385   : > { %2242 = vrot.lane.b32.xlu0 %v1833_v15, %s3001_s26 }
 0x388   : > { %2244 = vrot.lane.b32.xlu1 %v2997_v6, %s3001_s26 }
 0x389   : > { %2240 = vrot.lane.b32.xlu0 %v1832_v13, %s3001_s26 }
 0x38c   : > { %2107 = vrot.lane.b32.xlu1 %v1832_v13, %s3002_s14 }
 0x38d   : > { %2303 = vrot.lane.b32.xlu0 %v1832_v13, %s3003_s29 }
 0x390   : > { %2105 = vrot.lane.b32.xlu1 %v2997_v6, %s3002_s14 }
 0x391   : > { %2109 = vrot.lane.b32.xlu0 %v1833_v15, %s3002_s14  ;;  %s2687_s14 = sshll.u32 %s3079_s13, 9  ;;  %s2462_s13 = scalar_lea.sflag [#allocation5], %s3199_s1 }
 0x392   : > { %s3593_s19 = scalar_lea.hbm %s3647_s9, %s2687_s14 }
 0x394   : > { %2305 = vrot.lane.b32.xlu1 %v1833_v15, %s3003_s29 }
 0x395   : > { %2301 = vrot.lane.b32.xlu0 %v2997_v6, %s3003_s29 }
 0x398   : > { %2169 = vrot.lane.b32.xlu1 %v1832_v13, %s3672_s24 }
 0x399   : > { %2173 = vrot.lane.b32.xlu0 %v2997_v6, %s3672_s24 }
 0x39c   : > { %2171 = vrot.lane.b32.xlu1 %v1833_v15, %s3672_s24  ;;  %s2568_s24 = sshll.u32 %s3199_s1, 5 }
 0x39d   : > { %2367 = vrot.lane.b32.xlu0 %v1833_v15, %s3673_s25 }
 0x3a0   : > { %2369 = vrot.lane.b32.xlu1 %v2997_v6, %s3673_s25 }
 0x3a1   : > { %2365 = vrot.lane.b32.xlu0 %v1832_v13, %s3673_s25  ;;  %s361_s25 = scalar_lea.vmem [#allocation8], %s2568_s24 }
 0x3a2   : > { %s2475_s26 = sshll.u32 %s361_s25, 4  ;;  %s3588_s26 = int_to_ptr.vmem [resolvable:$true] %s2475_s26 }
 0x3a3   : > { %s2922_s22 = scalar_lea.vmem %s3588_s26, 512  ;;  %p2929_p13 = scmp.lt.s32.totalorder %s3588_s26, %s2927_s23 }
 0x3a4   : > { %2445 = vperm.xlu1 %2829, %v2441_v17   ;;  %p2923_p6 = scmp.ne.s32.totalorder %s3588_s26, %s2922_s22  ;;  %p2930_p0 = scmp.lt.s32.totalorder %s2928_s28, %s2922_s22 }
 0x3a5   : > { %2450 = vperm.xlu0 %2828, %v2442_v18  }
 0x3a6   : > { %p2924_p9 = pnand %p2923_p6, %p3150_p8  ;;  %p2931_p5 = por %p2930_p0, %p2929_p13 }
 0x3a8   : > { %p2925_p12 = pneg %p2924_p9 }
 0x3aa   : > { %p2932_p10 = pnand %p2931_p5, %p2925_p12 }
 0x3e6   : > { %v1907_v19 = vpop.permute.xlu1 %1906 }
 0x3e7   : > { %v1909_v20 = vpop.permute.xlu0 %1908 }
 0x3e8   : > { %v1911_v21 = vsel %vm471_vm2, %v1907_v19, %v1909_v20 }
 0x3e9   : > { %1917 = vmatprep.subr.bf16.mxu0 %v1911_v21 }
 0x3ea   : > { %v1905_v22 = vpop.permute.xlu1 %1904 }
 0x3eb   : > { %v1910_v23 = vsel %vm471_vm2, %v1905_v22, %v1907_v19  ;;  %v1975_v24 = vpop.permute.xlu0 %1974 }
 0x3ec   : > { %1918 = vmatpush1.bf16.msra.mxu0 %v1910_v23 }
 0x3ee   : > { %v1979_v26 = vpop.permute.xlu1 %1978 }
 0x3ef   : > { %v1977_v27 = vpop.permute.xlu0 %1976  ;;  %2654 = vmatmul.mubr.msk.bf16.vlgmr.msra.gmra.mrb[12].mxu0 %vm471_vm2, %v2856_v25 }
 0x3f0   : > { %v1980_v28 = vsel %vm558_vm3, %v1975_v24, %v1977_v27  ;;  %v1981_v29 = vsel %vm558_vm3, %v1977_v27, %v1979_v26  ;;  %2019 = vmatprep.mubr.bf16.mxu0 %v2997_v6 }
 0x3f1   : > { %1987 = vmatprep.subr.bf16.mxu0 %v1981_v29 }
 0x3f2   : > { %v2047_v30 = vpop.permute.xlu1 %2046  ;;  %1988 = vmatpush1.bf16.msra.mxu0 %v1980_v28 }
 0x3f3   : > { %v2049_v31 = vpop.permute.xlu0 %2048 }
 0x3f4   : > { %v2051_v32 = vsel %vm651_vm4, %v2047_v30, %v2049_v31 }
 0x3f5   : > { %2057 = vmatprep.subr.bf16.mxu1 %v2051_v32 }
 0x3f6   : > { %v2045_v33 = vpop.permute.xlu1 %2044 }
 0x3f7   : > { %v2050_v34 = vsel %vm651_vm4, %v2045_v33, %v2047_v30  ;;  %v2243_v35 = vpop.permute.xlu0 %2242 }
 0x3f8   : > { %2058 = vmatpush1.bf16.msra.mxu1 %v2050_v34 }
 0x3fa   : > { %v2245_v38 = vpop.permute.xlu1 %2244 }
 0x3fb   : > { %v2241_v39 = vpop.permute.xlu0 %2240  ;;  %2658 = vmatmul.mubr.msk.bf16.vlgmr.msra.gmra.mrb[12].mxu0 %vm471_vm2, %v2857_v36  ;;  %v2247_v40 = vsel %vm899_vm5, %v2243_v35, %v2245_v38  ;;  %2662 = vmatmul.mubr.msk.bf16.vlgmr.msra.gmra.mrb[16].mxu1 %vm471_vm2, %v2858_v37 }
 0x3fc   : > { %v2246_v41 = vsel %vm899_vm5, %v2241_v39, %v2243_v35  ;;  %2253 = vmatprep.subr.bf16.mxu0 %v2247_v40  ;;  %2285 = vmatprep.mubr.bf16.mxu0 %v2997_v6 }
 0x3fd   : > { %2254 = vmatpush1.bf16.msra.mxu0 %v2246_v41  ;;  %2150 = vmatprep.mubr.bf16.mxu1 %v2997_v6 }
 0x3fe   : > { %v2108_v42 = vpop.permute.xlu1 %2107 }
 0x3ff   : > { %v2304_v43 = vpop.permute.xlu0 %2303 }
 0x402   : > { %v2106_v45 = vpop.permute.xlu1 %2105 }
 0x403   : > { %v2110_v46 = vpop.permute.xlu0 %2109  ;;  %2674 = vmatmul.mubr.msk.bf16.vlgmr.msra.gmra.mrb[16].mxu0 %vm471_vm2, %v2859_v44  ;;  %v2111_v48 = vsel %vm717_vm6, %v2106_v45, %v2108_v42 }
 0x404   : > { %v2112_v47 = vsel %vm717_vm6, %v2108_v42, %v2110_v46  ;;  %2346 = vmatprep.mubr.bf16.mxu0 %v2997_v6 }
 0x405   : > { %2118 = vmatprep.subr.bf16.mxu1 %v2112_v47 }
 0x406   : > { %v2306_v50 = vpop.permute.xlu1 %2305  ;;  %2119 = vmatpush1.bf16.msra.mxu1 %v2111_v48 }
 0x407   : > { %v2302_v51 = vpop.permute.xlu0 %2301  ;;  %v2308_v52 = vsel %vm982_vm7, %v2304_v43, %v2306_v50 }
 0x408   : > { %v2307_v53 = vsel %vm982_vm7, %v2302_v51, %v2304_v43  ;;  %2314 = vmatprep.subr.bf16.mxu0 %v2308_v52 }
 0x409   : > { %2664 = vmatmul.mubr.msk.bf16.vlgmr.msra.gmra.mrb[16].mxu1 %vm471_vm2, %v2860_v49  ;;  %2315 = vmatpush1.bf16.msra.mxu0 %v2307_v53 }
 0x40a   : > { %v2170_v54 = vpop.permute.xlu1 %2169  ;;  %2214 = vmatprep.mubr.bf16.mxu1 %v2997_v6 }
 0x40b   : > { %v2174_v55 = vpop.permute.xlu0 %2173 }
 0x40e   : > { %v2172_v59 = vpop.permute.xlu1 %2171 }
 0x40f   : > { %v2175_v60 = vsel %vm804_vm8, %v2170_v54, %v2172_v59  ;;  %v2368_v61 = vpop.permute.xlu0 %2367  ;;  %2676 = vmatmul.mubr.msk.bf16.vlgmr.msra.gmra.mrb[16].mxu0 %vm471_vm2, %v2861_v56  ;;  %v2176_v62 = vsel %vm804_vm8, %v2172_v59, %v2174_v55 }
 0x410   : > { %2182 = vmatprep.subr.bf16.mxu1 %v2176_v62  ;;  %2410 = vmatprep.mubr.bf16.mxu0 %v2997_v6 }
 0x411   : > { %2183 = vmatpush1.bf16.msra.mxu1 %v2175_v60 }
 0x412   : > { %v2370_v0 = vpop.permute.xlu1 %2369 }
 0x413   : > { %v2366_v1 = vpop.permute.xlu0 %2365  ;;  %v2372_v2 = vsel %vm1069_vm9, %v2368_v61, %v2370_v0 }
 0x414   : > { %v2371_v4 = vsel %vm1069_vm9, %v2366_v1, %v2368_v61  ;;  %2378 = vmatprep.subr.bf16.mxu0 %v2372_v2 }
 0x415   : > { %2668 = vmatmul.mubr.msk.bf16.vlgmr.msra.gmra.mrb[16].mxu1 %vm471_vm2, %v2862_v63  ;;  %2379 = vmatpush1.bf16.msra.mxu0 %v2371_v4 }
 0x41b   : > { %2680 = vmatmul.mubr.msk.bf16.vlgmr.msra.gmra.mrb[16].mxu0 %vm471_vm2, %v2863_v3 }
 0x424   : > { %v2451_v34 = vpop.permute.xlu0 %2450 }
 0x4ce   : > { %v2021_v6 = vpop.f32.mrb[12].mxu0 }
 0x4cf   : > { %v2023_v5 = vpop.f32.mrb[13].mxu0 }
 0x4d0   : > { %v2025_v7 = vpop.f32.mrb[14].mxu0 }
 0x4d1   : > { %v2027_v9 = vpop.f32.mrb[15].mxu0 }
 0x4e8   : > { %v2216_v11 = vpop.f32.mrb[16].mxu1 }
 0x4e9   : > { %v2425_v12 = vmul.f32 %v2216_v11, %v3355_v57  ;;  %v2218_v13 = vpop.f32.mrb[17].mxu1 }
 0x4ea   : > { %v2426_v14 = vmul.f32 %v2218_v13, %v3357_v58  ;;  %v2220_v15 = vpop.f32.mrb[18].mxu1 }
 0x4eb   : > { %v2429_v16 = vadd.f32 %v2425_v12, %v2021_v6  ;;  %v2427_v17 = vmul.f32 %v2220_v15, %v3355_v57  ;;  %v2222_v18 = vpop.f32.mrb[19].mxu1  ;;  %v2446_v57 = vpop.permute.xlu1 %2445 }
 0x4ec   : > { %v2430_v19 = vadd.f32 %v2426_v14, %v2023_v5  ;;  %v2428_v20 = vmul.f32 %v2222_v18, %v3357_v58 }
 0x4ed   : > { %v2431_v21 = vadd.f32 %v2427_v17, %v2025_v7 }
 0x4ee   : > { %v2432_v22 = vadd.f32 %v2428_v20, %v2027_v9  ;;  %v2412_v23 = vpop.f32.mrb[16].mxu0 }
 0x4ef   : > { %v2433_v24 = vmul.f32 %v2412_v23, %v3366_v8  ;;  %v2414_v25 = vpop.f32.mrb[17].mxu0 }
 0x4f0   : > { %v2434_v26 = vmul.f32 %v2414_v25, %v3368_v10  ;;  %v2416_v27 = vpop.f32.mrb[18].mxu0 }
 0x4f1   : > { %v2437_v28 = vadd.f32 %v2433_v24, %v2429_v16  ;;  %v2435_v29 = vmul.f32 %v2416_v27, %v3366_v8  ;;  %v2418_v30 = vpop.f32.mrb[19].mxu0 }
 0x4f2   : > { %v2438_v31 = vadd.f32 %v2434_v26, %v2430_v19  ;;  %v2436_v58 = vmul.f32 %v2418_v30, %v3368_v10 }
 0x4f3   : > { %v2453_v32 = vadd.f32 %v2446_v57, %v2437_v28  ;;  %v2439_v33 = vadd.f32 %v2435_v29, %v2431_v21 }
 0x4f4   : > { %v2454_v35 = vadd.f32 %v2446_v57, %v2438_v31  ;;  %v2440_v36 = vadd.f32 %v2436_v58, %v2432_v22 }
 0x4f5   : > { %2457 = vst [vmem:[%s361_s25] sm:$0xff] %v2453_v32  ;;  %v2455_v8 = vadd.f32 %v2451_v34, %v2439_v33 }
 0x4f6   : > { %2458 = vst [vmem:[%s361_s25 + $0x8] sm:$0xff] %v2454_v35  ;;  %v2456_v37 = vadd.f32 %v2451_v34, %v2440_v36 }
 0x4f7   : > { %2459 = vst [vmem:[%s361_s25 + $0x10] sm:$0xff] %v2455_v8 }
 0x4f8   : > { %2460 = vst [vmem:[%s361_s25 + $0x18] sm:$0xff] %v2456_v37 }
 0x4f9   : > { %2935 = shalt.err (!%p2932_p10)
}
 0x4fa   : > { %s2936_s24 = scalar_lea.hbm %s3593_s19, 512  ;;  %s2940_s17 = scalar_lea.hbm %s3647_s9, 1024 }
 0x4fb   : > { %p2937_p1 = scmp.ne.s32.totalorder %s3593_s19, %s2936_s24  ;;  %p2941_p3 = scmp.lt.u32.totalorder %s3593_s19, %s3647_s9 }
 0x4fc   : > { %p2942_p11 = scmp.lt.u32.totalorder %s2940_s17, %s2936_s24  ;;  %p2944_p6 = scmp.lt.u32.totalorder %s2936_s24, %s3593_s19 }
 0x4fd   : > { %p2938_p2 = pnand %p2937_p1, %p3150_p8 }
 0x4fe   : > { %p2943_p4 = por %p2942_p11, %p2941_p3 }
 0x4ff   : > { %p2939_p7 = pneg %p2938_p2 }
 0x500   : > { %p2945_p9 = por %p2944_p6, %p2943_p4 }
 0x502   : > { %p2946_p12 = pnand %p2945_p9, %p2939_p7 }
 0x504   : > { %2949 = shalt.err (!%p2946_p12)
}
 0x505   : > { %s3007_s22 = smov 256  }
 0x506   : > { %2766 = dma.vmem_to_hbm [thread:$0]  (%p3150_p8), %s3588_s26, 512, %s3593_s19, %s2462_s13, %s3007_s22, %s3007_s22, %s2998_s15  }
 0x507 PF: > { %s2490_s23 = sand.u32 1, %s2980_s30   ;;  %p3674_p13 = scmp.ne.s32.totalorder %s3657_s16, 0 }
 0x508   : > { %p3675_p0 = scmp.ge.s32.totalorder %s2992_s12, 2  ;;  %s2491_s28 = scalar_lea.sflag [#allocation5], %s2490_s23 }
 0x50a   : > { %p2777_p5 = pnand %p3675_p0, %p3674_p13 }
 0x50c   : > { %2975 = dma.done.wait (!%p2777_p5), %s2491_s28, 512  }
 0x50d   : > { %2977 = vsyncadd (!%p2777_p5), %s2491_s28, 4294966784  ;;  %p23_p10 = scmp.ge.s32.totalorder %s3106_s20, 4   ;;  %s3676_s30 = smov %s2984_s10 }
 0x50e   : > { %s3677_s10 = smov %s2988_s11  ;;  %s3678_s11 = smov %s3142_s27 }
 0x50f   : > { %s3679_s12 = smov %s3106_s20  ;;  %25 = sbr.rel (!%p23_p10) target bundleno = 8 (0x8), region = 129 }
 0x516   :  { %2496 = vsyncpa [#allocation4], 1 }
 0x517   :  { %2498 = vsyncpa [#allocation4 + $0x1], 1 }
 0x518   :  { %2499 = vsyncpa [#allocation7], 1 }
 0x519   :  { %2500 = vsyncpa [#allocation5], 1 }
 0x51a   :  { %2502 = vsyncpa [#allocation5 + $0x1], 1 }

</bundles_post_ra>
